<compile_context>
chip_gen: v7x
topology: tpu7x:2x2x1
jax: 0.10.0
libtpu: 0.0.40
codegen_flags: <defaults>
</compile_context>

<pallas_src>
import jax
import jax.numpy as jnp
from jax.experimental import pallas as pl
from jax.experimental.pallas import tpu as pltpu

_VMEM_LIMIT = 32 * 1024 * 1024   # safe on all generations (v7x physical = 64 MiB)


# --------------------------- kernel A: KV producer ---------------------------

def _kv_sr_kernel(p_ref, wsr_ref, bsr_ref, g_ref, b_ref, wkv_ref, kv_ref):
    # t = patches @ w_sr + b_sr ; t = LayerNorm(t) ; kv[h] = t @ wkv[h]
    t = jnp.dot(p_ref[...], wsr_ref[...], preferred_element_type=jnp.float32)
    t = t + bsr_ref[...].astype(jnp.float32)
    # one-pass LayerNorm: var = E[t^2] - E[t]^2 (single cross-lane reduction pass)
    mean = jnp.mean(t, axis=-1, keepdims=True)
    msq = jnp.mean(t * t, axis=-1, keepdims=True)
    var = msq - mean * mean
    t = (t - mean) * jax.lax.rsqrt(var + 1e-5)                 # PyTorch LN eps
    t = t * g_ref[...].astype(jnp.float32) + b_ref[...].astype(jnp.float32)
    t = t.astype(wkv_ref.dtype)          # model dtype into the MXU (bf16 fast path)
    for h in range(wkv_ref.shape[0]):    # static unroll over 2*num_heads
        kv_ref[h] = jnp.dot(t, wkv_ref[h],
                            preferred_element_type=jnp.float32).astype(kv_ref.dtype)


def _kv_plain_kernel(x_ref, wkv_ref, kv_ref):
    x = x_ref[...]
    for h in range(wkv_ref.shape[0]):
        kv_ref[h] = jnp.dot(x, wkv_ref[h],
                            preferred_element_type=jnp.float32).astype(kv_ref.dtype)


def kv_from_sr(patches, w_sr, b_sr, ln_g, ln_b, wkv_heads, *, tm_max=256):
    """patches (M, sr*sr*C) -> fused sr-conv + LN + kv proj -> head-major (2H, M, hd)."""
    M, Kin = patches.shape
    nh2, C, hd = wkv_heads.shape
    tm = M if M <= tm_max else tm_max        # raise tm_max to 512 on v6e (128 MiB VMEM)
    return pl.pallas_call(
        _kv_sr_kernel,
        out_shape=jax.ShapeDtypeStruct((nh2, M, hd), patches.dtype),
        grid=(pl.cdiv(M, tm),),
        in_specs=[pl.BlockSpec((tm, Kin), lambda i: (i, 0)),
                  pl.BlockSpec((Kin, C), lambda i: (0, 0)),
                  pl.BlockSpec((1, C), lambda i: (0, 0)),
                  pl.BlockSpec((1, C), lambda i: (0, 0)),
                  pl.BlockSpec((1, C), lambda i: (0, 0)),
                  pl.BlockSpec((nh2, C, hd), lambda i: (0, 0, 0))],
        out_specs=pl.BlockSpec((nh2, tm, hd), lambda i: (0, i, 0)),
        compiler_params=pltpu.CompilerParams(
            dimension_semantics=("parallel",), vmem_limit_bytes=_VMEM_LIMIT),
    )(patches, w_sr, b_sr, ln_g, ln_b, wkv_heads)


def kv_plain(x2d, wkv_heads, *, tm_max=256):
    """x2d (M, C) -> kv projection (no bias) -> head-major (2H, M, hd)."""
    M, C = x2d.shape
    nh2, _, hd = wkv_heads.shape
    tm = M if M <= tm_max else tm_max
    return pl.pallas_call(
        _kv_plain_kernel,
        out_shape=jax.ShapeDtypeStruct((nh2, M, hd), x2d.dtype),
        grid=(pl.cdiv(M, tm),),
        in_specs=[pl.BlockSpec((tm, C), lambda i: (i, 0)),
                  pl.BlockSpec((nh2, C, hd), lambda i: (0, 0, 0))],
        out_specs=pl.BlockSpec((nh2, tm, hd), lambda i: (0, i, 0)),
        compiler_params=pltpu.CompilerParams(
            dimension_semantics=("parallel",), vmem_limit_bytes=_VMEM_LIMIT),
    )(x2d, wkv_heads)


# ------------- kernel B: fused q-proj + attention + output proj --------------

def _attn_fused_kernel(x_ref, kv_ref, wq_ref, wp_ref, bp_ref, o_ref):
    num_heads = wq_ref.shape[0]
    x = x_ref[0]                                   # (tq, C), model dtype
    acc = None                                     # f32 (tq, C) accumulator
    for h in range(num_heads):                     # static unroll; leading-axis head indexing
        # q projection; softmax scale is pre-folded into wq in the wrapper.
        qh = jnp.dot(x, wq_ref[h], preferred_element_type=jnp.float32)
        qh = qh.astype(x.dtype)                    # keep MXU operands in model dtype
        kh = kv_ref[h, 0]                          # (Nk, hd), model dtype (free index)
        vh = kv_ref[num_heads + h, 0]              # (Nk, hd)
        # contraction over the hd axis of BOTH operands -> no transpose
        s = jax.lax.dot_general(qh, kh, (((1,), (1,)), ((), ())),
                                preferred_element_type=jnp.float32)     # (tq, Nk) f32
        m = jnp.max(s, axis=-1, keepdims=True)
        p = jnp.exp(s - m)
        denom = jnp.sum(p, axis=-1, keepdims=True)
        oh = jnp.dot(p.astype(vh.dtype), vh, preferred_element_type=jnp.float32)
        # normalize AFTER the PV dot; approx reciprocal runs on the EUP slot.
        oh = oh * pl.reciprocal(denom, approx=True)
        ph = jnp.dot(oh.astype(wp_ref.dtype), wp_ref[h],
                     preferred_element_type=jnp.float32)                # (tq, C) f32
        acc = ph if acc is None else acc + ph
    out = acc + bp_ref[...].astype(jnp.float32)
    o_ref[0] = out.astype(o_ref.dtype)
    # attn_drop / proj_drop have p=0.0 -> identity (no-op)


def fused_attention(x, kv_heads, wq_heads, wp_heads, bproj, *, tq_max=256):
    B, N, C = x.shape
    nh2, _, Nk, hd = kv_heads.shape
    num_heads = nh2 // 2
    tq = N if N <= tq_max else tq_max      # 256 is v7x(64MiB)-safe; raise on v6e
    # TODO(synk): if this is ever used with sr_ratio=1 at large N (Nk >= ~1k), add a
    # third "arbitrary" grid axis over Nk with flash-style online-softmax scratch
    # instead of keeping the full (nh2, Nk, hd) kv block resident.
    return pl.pallas_call(
        _attn_fused_kernel,
        out_shape=jax.ShapeDtypeStruct((B, N, C), x.dtype),
        grid=(B, pl.cdiv(N, tq)),
        in_specs=[pl.BlockSpec((1, tq, C), lambda b, i: (b, i, 0)),
                  pl.BlockSpec((nh2, 1, Nk, hd), lambda b, i: (0, b, 0, 0)),
                  pl.BlockSpec((num_heads, C, hd), lambda b, i: (0, 0, 0)),
                  pl.BlockSpec((num_heads, hd, C), lambda b, i: (0, 0, 0)),
                  pl.BlockSpec((1, C), lambda b, i: (0, 0))],
        out_specs=pl.BlockSpec((1, tq, C), lambda b, i: (b, i, 0)),
        compiler_params=pltpu.CompilerParams(
            dimension_semantics=("parallel", "parallel"),
            vmem_limit_bytes=_VMEM_LIMIT),
    )(x, kv_heads, wq_heads, wp_heads, bproj)


# --------------------------- Module forward pass ----------------------------

def pvt_attention(x, H, W, params, *, num_heads, sr_ratio):
    """Forward of PVT Attention. x: (B, N, C) with N = H*W."""
    B, N, C = x.shape
    hd = C // num_heads
    scale = hd ** (-0.5)
    dtype = x.dtype

    # weight prep (free / one-off, done in f32 then cast to the model dtype):
    #   - fold the softmax scale into wq
    #   - head-major reshapes so kernels index heads on the leading axis
    wq_heads = (params["wq"].T * scale).reshape(C, num_heads, hd)
    wq_heads = wq_heads.transpose(1, 0, 2).astype(dtype)                # (H, C, hd)
    wkv_heads = params["wkv"].T.reshape(C, 2, num_heads, hd)
    wkv_heads = wkv_heads.transpose(1, 2, 0, 3).reshape(2 * num_heads, C, hd).astype(dtype)
    wp_heads = params["wproj"].T.reshape(num_heads, hd, C).astype(dtype)  # (H, hd, C)
    bproj = params["bproj"].reshape(1, C).astype(dtype)

    if sr_ratio > 1:
        # spatial reduction: strided conv (k=s=sr) == patch extraction + matmul.
        # Patch columns ordered (dy, dx, C) so the contiguous C axis stays innermost.
        Hs, Ws = H // sr_ratio, W // sr_ratio
        Nk = Hs * Ws
        patches = x.reshape(B, Hs, sr_ratio, Ws, sr_ratio, C)
        patches = patches.transpose(0, 1, 3, 2, 4, 5)                   # (B,Hs,Ws,dy,dx,C)
        patches = patches.reshape(B * Nk, sr_ratio * sr_ratio * C)
        w_sr = params["w_sr"].transpose(2, 3, 1, 0)                     # (dy,dx,Cin,Cout)
        w_sr = w_sr.reshape(sr_ratio * sr_ratio * C, C).astype(dtype)
        kv = kv_from_sr(patches, w_sr,
                        params["b_sr"].reshape(1, C).astype(dtype),
                        params["ln_g"].reshape(1, C).astype(dtype),
                        params["ln_b"].reshape(1, C).astype(dtype),
                        wkv_heads)                                      # (2H, B*Nk, hd)
    else:
        Nk = N
        kv = kv_plain(x.reshape(B * N, C), wkv_heads)                   # (2H, B*N, hd)

    kv = kv.reshape(2 * num_heads, B, Nk, hd)   # free reshape (split of a leading axis)

    # fused per-head q-proj + softmax attention + per-head output proj
    return fused_attention(x, kv, wq_heads, wp_heads, bproj)


# ------------------------------ Plain-JAX ref --------------------------------

def pvt_attention_ref(x, H, W, params, *, num_heads, sr_ratio):
    B, N, C = x.shape
    hd = C // num_heads
    scale = hd ** (-0.5)
    q = (x.reshape(B * N, C) @ params["wq"].T).reshape(B, N, num_heads, hd)
    q = q.transpose(0, 2, 1, 3)
    if sr_ratio > 1:
        x_img = x.reshape(B, H, W, C).transpose(0, 3, 1, 2)            # NCHW
        x_ = jax.lax.conv_general_dilated(
            x_img, params["w_sr"], window_strides=(sr_ratio, sr_ratio),
            padding="VALID", dimension_numbers=("NCHW", "OIHW", "NCHW"))
        x_ = x_ + params["b_sr"][None, :, None, None]
        Nk = (H // sr_ratio) * (W // sr_ratio)
        x_ = x_.reshape(B, C, Nk).transpose(0, 2, 1)
        mean = x_.mean(-1, keepdims=True)
        var = ((x_ - mean) ** 2).mean(-1, keepdims=True)
        x_ = (x_ - mean) / jnp.sqrt(var + 1e-5) * params["ln_g"] + params["ln_b"]
        kv_in = x_
    else:
        Nk = N
        kv_in = x
    kv = (kv_in.reshape(B * Nk, C) @ params["wkv"].T)
    kv = kv.reshape(B, Nk, 2, num_heads, hd).transpose(2, 0, 3, 1, 4)
    k, v = kv[0], kv[1]
    attn = jnp.einsum("bhnd,bhkd->bhnk", q, k) * scale
    attn = jax.nn.softmax(attn, axis=-1)
    o = jnp.einsum("bhnk,bhkd->bhnd", attn, v).transpose(0, 2, 1, 3).reshape(B, N, C)
    return o @ params["wproj"].T + params["bproj"]


# ----------------------------------- main ------------------------------------

if __name__ == "__main__":
    B, H, W, C = 2, 8, 8, 32
    num_heads = 2
    N = H * W

    key = jax.random.PRNGKey(0)
    keys = jax.random.split(key, 8)
    params = {
        "wq":    0.02 * jax.random.normal(keys[0], (C, C), jnp.float32),       # (out, in)
        "wkv":   0.02 * jax.random.normal(keys[1], (2 * C, C), jnp.float32),
        "wproj": 0.02 * jax.random.normal(keys[2], (C, C), jnp.float32),
        "bproj": 0.02 * jax.random.normal(keys[3], (C,), jnp.float32),
        "w_sr":  0.02 * jax.random.normal(keys[4], (C, C, 2, 2), jnp.float32),
        "b_sr":  0.02 * jax.random.normal(keys[5], (C,), jnp.float32),
        "ln_g":  1.0 + 0.02 * jax.random.normal(keys[6], (C,), jnp.float32),
        "ln_b":  0.02 * jax.random.normal(keys[7], (C,), jnp.float32),
    }
    x = jax.random.normal(jax.random.PRNGKey(1), (B, N, C), jnp.float32)

    for sr_ratio in (2, 1):     # exercise both the sr-conv path and the plain path
        fwd = jax.jit(lambda xx, pp: pvt_attention(
            xx, H, W, pp, num_heads=num_heads, sr_ratio=sr_ratio))
        out = jax.block_until_ready(fwd(x, params))
        ref = pvt_attention_ref(x, H, W, params, num_heads=num_heads, sr_ratio=sr_ratio)
        assert out.shape == (B, N, C)
        # 2e-4 abs tolerance: covers the approx (EUP) reciprocal in the softmax normalize
        err = jnp.max(jnp.abs(out - ref))
        assert err < 2e-4, f"Pallas mismatch vs JAX reference (sr={sr_ratio}): {err}"

    print("KERNEL_OK")
</pallas_src>

<mosaic_0001>
module attributes {stable_mosaic.version = 11 : i64} {
  func.func @_attn_fused_kernel(%arg0: i32, %arg1: i32, %arg2: memref<1x64x32xf32, #tpu.memory_space<vmem>>, %arg3: memref<4x1x16x16xf32, #tpu.memory_space<vmem>>, %arg4: memref<2x32x16xf32, #tpu.memory_space<vmem>>, %arg5: memref<2x16x32xf32, #tpu.memory_space<vmem>>, %arg6: memref<1x32xf32, #tpu.memory_space<vmem>>, %arg7: memref<1x64x32xf32, #tpu.memory_space<vmem>>) attributes {dimension_semantics = [#tpu.dimension_semantics<parallel>, #tpu.dimension_semantics<parallel>], iteration_bounds = array<i64: 2, 1>, scalar_prefetch = 0 : i64, scratch_operands = 0 : i64, tpu.core_type = #tpu.core_type<tc>, window_params = [{transform_indices = @transform_0, window_bounds = array<i64: 1, 64, 32>}, {transform_indices = @transform_1, window_bounds = array<i64: 4, 1, 16, 16>}, {pipeline_mode = #tpu.pipeline_mode<synchronous>, transform_indices = @transform_2, window_bounds = array<i64: 2, 32, 16>}, {pipeline_mode = #tpu.pipeline_mode<synchronous>, transform_indices = @transform_3, window_bounds = array<i64: 2, 16, 32>}, {pipeline_mode = #tpu.pipeline_mode<synchronous>, transform_indices = @transform_4, window_bounds = array<i64: 1, 32>}, {transform_indices = @transform_5, window_bounds = array<i64: 1, 64, 32>}]} {
    %c0 = arith.constant 0 : index
    %c0_0 = arith.constant 0 : index
    %c0_1 = arith.constant 0 : index
    %0 = vector.load %arg2[%c0, %c0_0, %c0_1] : memref<1x64x32xf32, #tpu.memory_space<vmem>>, vector<1x64x32xf32>
    %1 = vector.shape_cast %0 : vector<1x64x32xf32> to vector<64x32xf32>
    %c0_2 = arith.constant 0 : index
    %c0_3 = arith.constant 0 : index
    %c0_4 = arith.constant 0 : index
    %2 = vector.load %arg4[%c0_2, %c0_3, %c0_4] : memref<2x32x16xf32, #tpu.memory_space<vmem>>, vector<1x32x16xf32>
    %3 = vector.shape_cast %2 : vector<1x32x16xf32> to vector<32x16xf32>
    %cst = arith.constant dense<0.000000e+00> : vector<64x16xf32>
    %4 = tpu.matmul %1, %3, %cst {dimension_numbers = #tpu.dot_dimension_numbers<[1], [0], [0], [1], [0, 0, 1, 1], [], []>} : vector<64x32xf32>, vector<32x16xf32>, vector<64x16xf32> -> vector<64x16xf32>
    %c0_5 = arith.constant 0 : index
    %c0_6 = arith.constant 0 : index
    %c0_7 = arith.constant 0 : index
    %c0_8 = arith.constant 0 : index
    %5 = vector.load %arg3[%c0_5, %c0_6, %c0_7, %c0_8] : memref<4x1x16x16xf32, #tpu.memory_space<vmem>>, vector<1x1x16x16xf32>
    %6 = vector.shape_cast %5 : vector<1x1x16x16xf32> to vector<16x16xf32>
    %c2 = arith.constant 2 : index
    %c0_9 = arith.constant 0 : index
    %c0_10 = arith.constant 0 : index
    %c0_11 = arith.constant 0 : index
    %7 = vector.load %arg3[%c2, %c0_9, %c0_10, %c0_11] : memref<4x1x16x16xf32, #tpu.memory_space<vmem>>, vector<1x1x16x16xf32>
    %8 = vector.shape_cast %7 : vector<1x1x16x16xf32> to vector<16x16xf32>
    %cst_12 = arith.constant dense<0.000000e+00> : vector<64x16xf32>
    %9 = tpu.matmul %4, %6, %cst_12 {dimension_numbers = #tpu.dot_dimension_numbers<[1], [1], [0], [0], [0, 0, 1, 0], [], []>} : vector<64x16xf32>, vector<16x16xf32>, vector<64x16xf32> -> vector<64x16xf32>
    %cst_13 = arith.constant dense<0xFF800000> : vector<64xf32>
    %10 = vector.multi_reduction <maximumf>, %9, %cst_13 [1] : vector<64x16xf32> to vector<64xf32>
    %11 = vector.shape_cast %10 : vector<64xf32> to vector<64x1xf32>
    %12 = vector.broadcast %11 : vector<64x1xf32> to vector<64x16xf32>
    %13 = arith.subf %9, %12 : vector<64x16xf32>
    %14 = math.exp %13 : vector<64x16xf32>
    %cst_14 = arith.constant dense<0.000000e+00> : vector<64xf32>
    %15 = vector.multi_reduction <add>, %14, %cst_14 [1] : vector<64x16xf32> to vector<64xf32>
    %16 = vector.shape_cast %15 : vector<64xf32> to vector<64x1xf32>
    %cst_15 = arith.constant dense<0.000000e+00> : vector<64x16xf32>
    %17 = tpu.matmul %14, %8, %cst_15 {dimension_numbers = #tpu.dot_dimension_numbers<[1], [0], [0], [1], [0, 0, 1, 1], [], []>} : vector<64x16xf32>, vector<16x16xf32>, vector<64x16xf32> -> vector<64x16xf32>
    %18 = tpu.reciprocal %16 {approx = true} : vector<64x1xf32> -> vector<64x1xf32>
    %19 = vector.broadcast %18 : vector<64x1xf32> to vector<64x16xf32>
    %20 = arith.mulf %17, %19 : vector<64x16xf32>
    %c0_16 = arith.constant 0 : index
    %c0_17 = arith.constant 0 : index
    %c0_18 = arith.constant 0 : index
    %21 = vector.load %arg5[%c0_16, %c0_17, %c0_18] : memref<2x16x32xf32, #tpu.memory_space<vmem>>, vector<1x16x32xf32>
    %22 = vector.shape_cast %21 : vector<1x16x32xf32> to vector<16x32xf32>
    %cst_19 = arith.constant dense<0.000000e+00> : vector<64x32xf32>
    %23 = tpu.matmul %20, %22, %cst_19 {dimension_numbers = #tpu.dot_dimension_numbers<[1], [0], [0], [1], [0, 0, 1, 1], [], []>} : vector<64x16xf32>, vector<16x32xf32>, vector<64x32xf32> -> vector<64x32xf32>
    %c1 = arith.constant 1 : index
    %c0_20 = arith.constant 0 : index
    %c0_21 = arith.constant 0 : index
    %24 = vector.load %arg4[%c1, %c0_20, %c0_21] : memref<2x32x16xf32, #tpu.memory_space<vmem>>, vector<1x32x16xf32>
    %25 = vector.shape_cast %24 : vector<1x32x16xf32> to vector<32x16xf32>
    %cst_22 = arith.constant dense<0.000000e+00> : vector<64x16xf32>
    %26 = tpu.matmul %1, %25, %cst_22 {dimension_numbers = #tpu.dot_dimension_numbers<[1], [0], [0], [1], [0, 0, 1, 1], [], []>} : vector<64x32xf32>, vector<32x16xf32>, vector<64x16xf32> -> vector<64x16xf32>
    %c1_23 = arith.constant 1 : index
    %c0_24 = arith.constant 0 : index
    %c0_25 = arith.constant 0 : index
    %c0_26 = arith.constant 0 : index
    %27 = vector.load %arg3[%c1_23, %c0_24, %c0_25, %c0_26] : memref<4x1x16x16xf32, #tpu.memory_space<vmem>>, vector<1x1x16x16xf32>
    %28 = vector.shape_cast %27 : vector<1x1x16x16xf32> to vector<16x16xf32>
    %c3 = arith.constant 3 : index
    %c0_27 = arith.constant 0 : index
    %c0_28 = arith.constant 0 : index
    %c0_29 = arith.constant 0 : index
    %29 = vector.load %arg3[%c3, %c0_27, %c0_28, %c0_29] : memref<4x1x16x16xf32, #tpu.memory_space<vmem>>, vector<1x1x16x16xf32>
    %30 = vector.shape_cast %29 : vector<1x1x16x16xf32> to vector<16x16xf32>
    %cst_30 = arith.constant dense<0.000000e+00> : vector<64x16xf32>
    %31 = tpu.matmul %26, %28, %cst_30 {dimension_numbers = #tpu.dot_dimension_numbers<[1], [1], [0], [0], [0, 0, 1, 0], [], []>} : vector<64x16xf32>, vector<16x16xf32>, vector<64x16xf32> -> vector<64x16xf32>
    %cst_31 = arith.constant dense<0xFF800000> : vector<64xf32>
    %32 = vector.multi_reduction <maximumf>, %31, %cst_31 [1] : vector<64x16xf32> to vector<64xf32>
    %33 = vector.shape_cast %32 : vector<64xf32> to vector<64x1xf32>
    %34 = vector.broadcast %33 : vector<64x1xf32> to vector<64x16xf32>
    %35 = arith.subf %31, %34 : vector<64x16xf32>
    %36 = math.exp %35 : vector<64x16xf32>
    %cst_32 = arith.constant dense<0.000000e+00> : vector<64xf32>
    %37 = vector.multi_reduction <add>, %36, %cst_32 [1] : vector<64x16xf32> to vector<64xf32>
    %38 = vector.shape_cast %37 : vector<64xf32> to vector<64x1xf32>
    %cst_33 = arith.constant dense<0.000000e+00> : vector<64x16xf32>
    %39 = tpu.matmul %36, %30, %cst_33 {dimension_numbers = #tpu.dot_dimension_numbers<[1], [0], [0], [1], [0, 0, 1, 1], [], []>} : vector<64x16xf32>, vector<16x16xf32>, vector<64x16xf32> -> vector<64x16xf32>
    %40 = tpu.reciprocal %38 {approx = true} : vector<64x1xf32> -> vector<64x1xf32>
    %41 = vector.broadcast %40 : vector<64x1xf32> to vector<64x16xf32>
    %42 = arith.mulf %39, %41 : vector<64x16xf32>
    %c1_34 = arith.constant 1 : index
    %c0_35 = arith.constant 0 : index
    %c0_36 = arith.constant 0 : index
    %43 = vector.load %arg5[%c1_34, %c0_35, %c0_36] : memref<2x16x32xf32, #tpu.memory_space<vmem>>, vector<1x16x32xf32>
    %44 = vector.shape_cast %43 : vector<1x16x32xf32> to vector<16x32xf32>
    %cst_37 = arith.constant dense<0.000000e+00> : vector<64x32xf32>
    %45 = tpu.matmul %42, %44, %cst_37 {dimension_numbers = #tpu.dot_dimension_numbers<[1], [0], [0], [1], [0, 0, 1, 1], [], []>} : vector<64x16xf32>, vector<16x32xf32>, vector<64x32xf32> -> vector<64x32xf32>
    %46 = arith.addf %23, %45 : vector<64x32xf32>
    %c0_38 = arith.constant 0 : index
    %c0_39 = arith.constant 0 : index
    %47 = vector.load %arg6[%c0_38, %c0_39] : memref<1x32xf32, #tpu.memory_space<vmem>>, vector<1x32xf32>
    %48 = vector.broadcast %47 : vector<1x32xf32> to vector<64x32xf32>
    %49 = arith.addf %46, %48 : vector<64x32xf32>
    %c0_40 = arith.constant 0 : index
    %c0_41 = arith.constant 0 : index
    %c0_42 = arith.constant 0 : index
    %50 = vector.load %arg7[%c0_40, %c0_41, %c0_42] : memref<1x64x32xf32, #tpu.memory_space<vmem>>, vector<1x64x32xf32>
    %51 = vector.shape_cast %50 : vector<1x64x32xf32> to vector<64x32xf32>
    %52 = vector.shape_cast %49 : vector<64x32xf32> to vector<1x64x32xf32>
    tpu.vector_store %arg7[%c0_40, %c0_41, %c0_42], %52 {strides = array<i32>} : memref<1x64x32xf32, #tpu.memory_space<vmem>>, vector<1x64x32xf32>,
    return
  }
  func.func @transform_0(%arg0: i32, %arg1: i32) -> (i32, i32, i32) {
    %c0_i32 = arith.constant 0 : i32
    %c0_i32_0 = arith.constant 0 : i32
    return %arg0, %arg1, %c0_i32 : i32, i32, i32
  }
  func.func @transform_1(%arg0: i32, %arg1: i32) -> (i32, i32, i32, i32) {
    %c0_i32 = arith.constant 0 : i32
    %c0_i32_0 = arith.constant 0 : i32
    %c0_i32_1 = arith.constant 0 : i32
    %c0_i32_2 = arith.constant 0 : i32
    return %c0_i32, %arg0, %c0_i32_0, %c0_i32_1 : i32, i32, i32, i32
  }
  func.func @transform_2(%arg0: i32, %arg1: i32) -> (i32, i32, i32) {
    %c0_i32 = arith.constant 0 : i32
    %c0_i32_0 = arith.constant 0 : i32
    %c0_i32_1 = arith.constant 0 : i32
    %c0_i32_2 = arith.constant 0 : i32
    return %c0_i32, %c0_i32_0, %c0_i32_1 : i32, i32, i32
  }
  func.func @transform_3(%arg0: i32, %arg1: i32) -> (i32, i32, i32) {
    %c0_i32 = arith.constant 0 : i32
    %c0_i32_0 = arith.constant 0 : i32
    %c0_i32_1 = arith.constant 0 : i32
    %c0_i32_2 = arith.constant 0 : i32
    return %c0_i32, %c0_i32_0, %c0_i32_1 : i32, i32, i32
  }
  func.func @transform_4(%arg0: i32, %arg1: i32) -> (i32, i32) {
    %c0_i32 = arith.constant 0 : i32
    %c0_i32_0 = arith.constant 0 : i32
    %c0_i32_1 = arith.constant 0 : i32
    return %c0_i32, %c0_i32_0 : i32, i32
  }
  func.func @transform_5(%arg0: i32, %arg1: i32) -> (i32, i32, i32) {
    %c0_i32 = arith.constant 0 : i32
    %c0_i32_0 = arith.constant 0 : i32
    return %arg0, %arg1, %c0_i32 : i32, i32, i32
  }
}

module attributes {stable_mosaic.version = 11 : i64} {
  func.func @_kv_sr_kernel(%arg0: i32, %arg1: memref<32x128xf32, #tpu.memory_space<vmem>>, %arg2: memref<128x32xf32, #tpu.memory_space<vmem>>, %arg3: memref<1x32xf32, #tpu.memory_space<vmem>>, %arg4: memref<1x32xf32, #tpu.memory_space<vmem>>, %arg5: memref<1x32xf32, #tpu.memory_space<vmem>>, %arg6: memref<4x32x16xf32, #tpu.memory_space<vmem>>, %arg7: memref<4x32x16xf32, #tpu.memory_space<vmem>>) attributes {dimension_semantics = [#tpu.dimension_semantics<parallel>], iteration_bounds = array<i64: 1>, scalar_prefetch = 0 : i64, scratch_operands = 0 : i64, tpu.core_type = #tpu.core_type<tc>, window_params = [{transform_indices = @transform_0, window_bounds = array<i64: 32, 128>}, {pipeline_mode = #tpu.pipeline_mode<synchronous>, transform_indices = @transform_1, window_bounds = array<i64: 128, 32>}, {pipeline_mode = #tpu.pipeline_mode<synchronous>, transform_indices = @transform_2, window_bounds = array<i64: 1, 32>}, {pipeline_mode = #tpu.pipeline_mode<synchronous>, transform_indices = @transform_3, window_bounds = array<i64: 1, 32>}, {pipeline_mode = #tpu.pipeline_mode<synchronous>, transform_indices = @transform_4, window_bounds = array<i64: 1, 32>}, {pipeline_mode = #tpu.pipeline_mode<synchronous>, transform_indices = @transform_5, window_bounds = array<i64: 4, 32, 16>}, {transform_indices = @transform_6, window_bounds = array<i64: 4, 32, 16>}]} {
    %c0 = arith.constant 0 : index
    %c0_0 = arith.constant 0 : index
    %0 = vector.load %arg1[%c0, %c0_0] : memref<32x128xf32, #tpu.memory_space<vmem>>, vector<32x128xf32>
    %c0_1 = arith.constant 0 : index
    %c0_2 = arith.constant 0 : index
    %1 = vector.load %arg2[%c0_1, %c0_2] : memref<128x32xf32, #tpu.memory_space<vmem>>, vector<128x32xf32>
    %cst = arith.constant dense<0.000000e+00> : vector<32x32xf32>
    %2 = tpu.matmul %0, %1, %cst {dimension_numbers = #tpu.dot_dimension_numbers<[1], [0], [0], [1], [0, 0, 1, 1], [], []>} : vector<32x128xf32>, vector<128x32xf32>, vector<32x32xf32> -> vector<32x32xf32>
    %c0_3 = arith.constant 0 : index
    %c0_4 = arith.constant 0 : index
    %3 = vector.load %arg3[%c0_3, %c0_4] : memref<1x32xf32, #tpu.memory_space<vmem>>, vector<1x32xf32>
    %4 = vector.broadcast %3 : vector<1x32xf32> to vector<32x32xf32>
    %5 = arith.addf %2, %4 : vector<32x32xf32>
    %cst_5 = arith.constant dense<0.000000e+00> : vector<32xf32>
    %6 = vector.multi_reduction <add>, %5, %cst_5 [1] : vector<32x32xf32> to vector<32xf32>
    %7 = vector.shape_cast %6 : vector<32xf32> to vector<32x1xf32>
    %cst_6 = arith.constant 3.200000e+01 : f32
    %8 = vector.broadcast %cst_6 : f32 to vector<32x1xf32>
    %9 = arith.divf %7, %8 : vector<32x1xf32>
    %10 = arith.mulf %5, %5 : vector<32x32xf32>
    %cst_7 = arith.constant dense<0.000000e+00> : vector<32xf32>
    %11 = vector.multi_reduction <add>, %10, %cst_7 [1] : vector<32x32xf32> to vector<32xf32>
    %12 = vector.shape_cast %11 : vector<32xf32> to vector<32x1xf32>
    %cst_8 = arith.constant 3.200000e+01 : f32
    %13 = vector.broadcast %cst_8 : f32 to vector<32x1xf32>
    %14 = arith.divf %12, %13 : vector<32x1xf32>
    %15 = arith.mulf %9, %9 : vector<32x1xf32>
    %16 = arith.subf %14, %15 : vector<32x1xf32>
    %17 = vector.broadcast %9 : vector<32x1xf32> to vector<32x32xf32>
    %18 = arith.subf %5, %17 : vector<32x32xf32>
    %cst_9 = arith.constant 9.99999974E-6 : f32
    %19 = vector.broadcast %cst_9 : f32 to vector<32x1xf32>
    %20 = arith.addf %16, %19 : vector<32x1xf32>
    %21 = math.rsqrt %20 : vector<32x1xf32>
    %22 = vector.broadcast %21 : vector<32x1xf32> to vector<32x32xf32>
    %23 = arith.mulf %18, %22 : vector<32x32xf32>
    %c0_10 = arith.constant 0 : index
    %c0_11 = arith.constant 0 : index
    %24 = vector.load %arg4[%c0_10, %c0_11] : memref<1x32xf32, #tpu.memory_space<vmem>>, vector<1x32xf32>
    %25 = vector.broadcast %24 : vector<1x32xf32> to vector<32x32xf32>
    %26 = arith.mulf %23, %25 : vector<32x32xf32>
    %c0_12 = arith.constant 0 : index
    %c0_13 = arith.constant 0 : index
    %27 = vector.load %arg5[%c0_12, %c0_13] : memref<1x32xf32, #tpu.memory_space<vmem>>, vector<1x32xf32>
    %28 = vector.broadcast %27 : vector<1x32xf32> to vector<32x32xf32>
    %29 = arith.addf %26, %28 : vector<32x32xf32>
    %c0_14 = arith.constant 0 : index
    %c0_15 = arith.constant 0 : index
    %c0_16 = arith.constant 0 : index
    %30 = vector.load %arg6[%c0_14, %c0_15, %c0_16] : memref<4x32x16xf32, #tpu.memory_space<vmem>>, vector<1x32x16xf32>
    %31 = vector.shape_cast %30 : vector<1x32x16xf32> to vector<32x16xf32>
    %cst_17 = arith.constant dense<0.000000e+00> : vector<32x16xf32>
    %32 = tpu.matmul %29, %31, %cst_17 {dimension_numbers = #tpu.dot_dimension_numbers<[1], [0], [0], [1], [0, 0, 1, 1], [], []>} : vector<32x32xf32>, vector<32x16xf32>, vector<32x16xf32> -> vector<32x16xf32>
    %c0_18 = arith.constant 0 : index
    %c0_19 = arith.constant 0 : index
    %c0_20 = arith.constant 0 : index
    %33 = vector.load %arg7[%c0_18, %c0_19, %c0_20] : memref<4x32x16xf32, #tpu.memory_space<vmem>>, vector<1x32x16xf32>
    %34 = vector.shape_cast %33 : vector<1x32x16xf32> to vector<32x16xf32>
    %35 = vector.shape_cast %32 : vector<32x16xf32> to vector<1x32x16xf32>
    tpu.vector_store %arg7[%c0_18, %c0_19, %c0_20], %35 {strides = array<i32>} : memref<4x32x16xf32, #tpu.memory_space<vmem>>, vector<1x32x16xf32>,
    %c1 = arith.constant 1 : index
    %c0_21 = arith.constant 0 : index
    %c0_22 = arith.constant 0 : index
    %36 = vector.load %arg6[%c1, %c0_21, %c0_22] : memref<4x32x16xf32, #tpu.memory_space<vmem>>, vector<1x32x16xf32>
    %37 = vector.shape_cast %36 : vector<1x32x16xf32> to vector<32x16xf32>
    %cst_23 = arith.constant dense<0.000000e+00> : vector<32x16xf32>
    %38 = tpu.matmul %29, %37, %cst_23 {dimension_numbers = #tpu.dot_dimension_numbers<[1], [0], [0], [1], [0, 0, 1, 1], [], []>} : vector<32x32xf32>, vector<32x16xf32>, vector<32x16xf32> -> vector<32x16xf32>
    %c1_24 = arith.constant 1 : index
    %c0_25 = arith.constant 0 : index
    %c0_26 = arith.constant 0 : index
    %39 = vector.load %arg7[%c1_24, %c0_25, %c0_26] : memref<4x32x16xf32, #tpu.memory_space<vmem>>, vector<1x32x16xf32>
    %40 = vector.shape_cast %39 : vector<1x32x16xf32> to vector<32x16xf32>
    %41 = vector.shape_cast %38 : vector<32x16xf32> to vector<1x32x16xf32>
    tpu.vector_store %arg7[%c1_24, %c0_25, %c0_26], %41 {strides = array<i32>} : memref<4x32x16xf32, #tpu.memory_space<vmem>>, vector<1x32x16xf32>,
    %c2 = arith.constant 2 : index
    %c0_27 = arith.constant 0 : index
    %c0_28 = arith.constant 0 : index
    %42 = vector.load %arg6[%c2, %c0_27, %c0_28] : memref<4x32x16xf32, #tpu.memory_space<vmem>>, vector<1x32x16xf32>
    %43 = vector.shape_cast %42 : vector<1x32x16xf32> to vector<32x16xf32>
    %cst_29 = arith.constant dense<0.000000e+00> : vector<32x16xf32>
    %44 = tpu.matmul %29, %43, %cst_29 {dimension_numbers = #tpu.dot_dimension_numbers<[1], [0], [0], [1], [0, 0, 1, 1], [], []>} : vector<32x32xf32>, vector<32x16xf32>, vector<32x16xf32> -> vector<32x16xf32>
    %c2_30 = arith.constant 2 : index
    %c0_31 = arith.constant 0 : index
    %c0_32 = arith.constant 0 : index
    %45 = vector.load %arg7[%c2_30, %c0_31, %c0_32] : memref<4x32x16xf32, #tpu.memory_space<vmem>>, vector<1x32x16xf32>
    %46 = vector.shape_cast %45 : vector<1x32x16xf32> to vector<32x16xf32>
    %47 = vector.shape_cast %44 : vector<32x16xf32> to vector<1x32x16xf32>
    tpu.vector_store %arg7[%c2_30, %c0_31, %c0_32], %47 {strides = array<i32>} : memref<4x32x16xf32, #tpu.memory_space<vmem>>, vector<1x32x16xf32>,
    %c3 = arith.constant 3 : index
    %c0_33 = arith.constant 0 : index
    %c0_34 = arith.constant 0 : index
    %48 = vector.load %arg6[%c3, %c0_33, %c0_34] : memref<4x32x16xf32, #tpu.memory_space<vmem>>, vector<1x32x16xf32>
    %49 = vector.shape_cast %48 : vector<1x32x16xf32> to vector<32x16xf32>
    %cst_35 = arith.constant dense<0.000000e+00> : vector<32x16xf32>
    %50 = tpu.matmul %29, %49, %cst_35 {dimension_numbers = #tpu.dot_dimension_numbers<[1], [0], [0], [1], [0, 0, 1, 1], [], []>} : vector<32x32xf32>, vector<32x16xf32>, vector<32x16xf32> -> vector<32x16xf32>
    %c3_36 = arith.constant 3 : index
    %c0_37 = arith.constant 0 : index
    %c0_38 = arith.constant 0 : index
    %51 = vector.load %arg7[%c3_36, %c0_37, %c0_38] : memref<4x32x16xf32, #tpu.memory_space<vmem>>, vector<1x32x16xf32>
    %52 = vector.shape_cast %51 : vector<1x32x16xf32> to vector<32x16xf32>
    %53 = vector.shape_cast %50 : vector<32x16xf32> to vector<1x32x16xf32>
    tpu.vector_store %arg7[%c3_36, %c0_37, %c0_38], %53 {strides = array<i32>} : memref<4x32x16xf32, #tpu.memory_space<vmem>>, vector<1x32x16xf32>,
    return
  }
  func.func @transform_0(%arg0: i32) -> (i32, i32) {
    %c0_i32 = arith.constant 0 : i32
    %c0_i32_0 = arith.constant 0 : i32
    return %arg0, %c0_i32 : i32, i32
  }
  func.func @transform_1(%arg0: i32) -> (i32, i32) {
    %c0_i32 = arith.constant 0 : i32
    %c0_i32_0 = arith.constant 0 : i32
    %c0_i32_1 = arith.constant 0 : i32
    return %c0_i32, %c0_i32_0 : i32, i32
  }
  func.func @transform_2(%arg0: i32) -> (i32, i32) {
    %c0_i32 = arith.constant 0 : i32
    %c0_i32_0 = arith.constant 0 : i32
    %c0_i32_1 = arith.constant 0 : i32
    return %c0_i32, %c0_i32_0 : i32, i32
  }
  func.func @transform_3(%arg0: i32) -> (i32, i32) {
    %c0_i32 = arith.constant 0 : i32
    %c0_i32_0 = arith.constant 0 : i32
    %c0_i32_1 = arith.constant 0 : i32
    return %c0_i32, %c0_i32_0 : i32, i32
  }
  func.func @transform_4(%arg0: i32) -> (i32, i32) {
    %c0_i32 = arith.constant 0 : i32
    %c0_i32_0 = arith.constant 0 : i32
    %c0_i32_1 = arith.constant 0 : i32
    return %c0_i32, %c0_i32_0 : i32, i32
  }
  func.func @transform_5(%arg0: i32) -> (i32, i32, i32) {
    %c0_i32 = arith.constant 0 : i32
    %c0_i32_0 = arith.constant 0 : i32
    %c0_i32_1 = arith.constant 0 : i32
    %c0_i32_2 = arith.constant 0 : i32
    return %c0_i32, %c0_i32_0, %c0_i32_1 : i32, i32, i32
  }
  func.func @transform_6(%arg0: i32) -> (i32, i32, i32) {
    %c0_i32 = arith.constant 0 : i32
    %c0_i32_0 = arith.constant 0 : i32
    %c0_i32_1 = arith.constant 0 : i32
    return %c0_i32, %arg0, %c0_i32_0 : i32, i32, i32
  }
}

</mosaic_0001>

<bundles_post_ra>
// kernel: _lambda_.2
= control target key start
LH: loop header
LB: loop body
LE: loop exit
PB: predicated region body
PF: predicated region fallthrough
CT: control target
= control target key end

     0   :  { %vm135_vm0 = vcmask 261120   ;;  %vm320_vm1 = vcmask 130048   ;;  %s1139_s1 = inlined_call_operand.vmem [shape: f32[128,32], index: 1, kind: input, shape index: {}]   ;;  %s1140_s0 = inlined_call_operand.vmem [shape: f32[32,128], index: 0, kind: input, shape index: {}]   ;;  %s1141_s2 = inlined_call_operand.vmem [shape: f32[1,32], index: 2, kind: input, shape index: {}]   ;;  %s1142_s5 = inlined_call_operand.vmem [shape: f32[4,32,16], index: 5, kind: input, shape index: {}]   ;;  %s1143_s3 = inlined_call_operand.vmem [shape: f32[1,32], index: 3, kind: input, shape index: {}]   ;;  %s1144_s4 = inlined_call_operand.vmem [shape: f32[1,32], index: 4, kind: input, shape index: {}]   ;;  %s1145_s6 = inlined_call_operand.vmem [shape: f32[4,32,16], index: 6, kind: output, shape index: {}]  }
   0x1   :  { %v27_v0 = vld [vmem:[%s1139_s1] sm:$0xff]  ;;  %v28_v1 = vld [vmem:[%s1139_s1 + $0x8] sm:$0xff]  ;;  %v29_v2 = vld [vmem:[%s1139_s1 + $0x10] sm:$0xff] }
   0x2   :  { %v803_v3 = vpack.c.bf16 %v28_v1, %v27_v0  ;;  %v30_v4 = vld [vmem:[%s1139_s1 + $0x18] sm:$0xff]  ;;  %v31_v6 = vld [vmem:[%s1139_s1 + $0x20] sm:$0xff]  ;;  %v32_v7 = vld [vmem:[%s1139_s1 + $0x28] sm:$0xff] }
   0x3   :  { %v807_v5 = vpack.c.bf16 %v30_v4, %v29_v2  ;;  %v811_v8 = vpack.c.bf16 %v32_v7, %v31_v6  ;;  %v23_v9 = vld [vmem:[%s1140_s0] sm:$0xff]  ;;  %v33_v10 = vld [vmem:[%s1139_s1 + $0x30] sm:$0xff]  ;;  %v34_v11 = vld [vmem:[%s1139_s1 + $0x38] sm:$0xff] }
   0x4   :  { %804 = vmatprep.subr.bf16.mxu0 %v803_v3  ;;  %741 = vmatprep.mubr.f32.mxu0 %v23_v9  ;;  %v815_v12 = vpack.c.bf16 %v34_v11, %v33_v10  ;;  %v35_v13 = vld [vmem:[%s1139_s1 + $0x40] sm:$0xff]  ;;  %v36_v14 = vld [vmem:[%s1139_s1 + $0x48] sm:$0xff]  ;;  %v37_v16 = vld [vmem:[%s1139_s1 + $0x50] sm:$0xff] }
   0x5   :  { %806 = vmatpush3.bf16.msra.mxu0 %v803_v3  ;;  %v819_v15 = vpack.c.bf16 %v36_v14, %v35_v13  ;;  %v38_v17 = vld [vmem:[%s1139_s1 + $0x58] sm:$0xff]  ;;  %v39_v19 = vld [vmem:[%s1139_s1 + $0x60] sm:$0xff]  ;;  %v40_v20 = vld [vmem:[%s1139_s1 + $0x68] sm:$0xff] }
   0x6   :  { %808 = vmatprep.subr.bf16.mxu0 %v807_v5  ;;  %v823_v18 = vpack.c.bf16 %v38_v17, %v37_v16  ;;  %v827_v21 = vpack.c.bf16 %v40_v20, %v39_v19  ;;  %v41_v22 = vld [vmem:[%s1139_s1 + $0x70] sm:$0xff]  ;;  %v42_v23 = vld [vmem:[%s1139_s1 + $0x78] sm:$0xff]  ;;  %v24_v25 = vld [vmem:[%s1140_s0 + $0x8] sm:$0xff] }
   0x7   :  { %v831_v24 = vpack.c.bf16 %v42_v23, %v41_v22  ;;  %v25_v26 = vld [vmem:[%s1140_s0 + $0x10] sm:$0xff]  ;;  %v26_v27 = vld [vmem:[%s1140_s0 + $0x18] sm:$0xff]  ;;  %v614_v28 = vld [vmem:[%s1141_s2] ss:$0 sm:$0xff] }
   0x8   :  { %v219_v49 = vld [vmem:[%s1142_s5] sm:$0xff]  ;;  %v220_v50 = vld [vmem:[%s1142_s5 + $0x8] sm:$0xff]  ;;  %v221_v52 = vld [vmem:[%s1142_s5 + $0x10] sm:$0xff] }
   0x9   :  { %810 = vmatpush3.bf16.msra.mxu0 %v807_v5  ;;  %v835_v51 = vpack.c.bf16 %v220_v50, %v219_v49  ;;  %v222_v53 = vld [vmem:[%s1142_s5 + $0x18] sm:$0xff]  ;;  %v621_v55 = vld [vmem:[%s1142_s5 + $0x20] sm:$0xff]  ;;  %v622_v56 = vld [vmem:[%s1142_s5 + $0x28] sm:$0xff] }
   0xa   :  { %812 = vmatprep.subr.bf16.mxu0 %v811_v8  ;;  %v839_v54 = vpack.c.bf16 %v222_v53, %v221_v52  ;;  %v843_v57 = vpack.c.bf16 %v622_v56, %v621_v55  ;;  %v635_v50 = vld [vmem:[%s1142_s5 + $0x50] sm:$0xff]  ;;  %v645_v53 = vld [vmem:[%s1142_s5 + $0x60] sm:$0xff] }
   0xb   :  { %836 = vmatprep.subr.bf16.mxu1 %v835_v51  ;;  %v647_v56 = vld [vmem:[%s1142_s5 + $0x70] sm:$0xff] }
   0xc   :  { %838 = vmatpush3.bf16.msra.mxu1 %v835_v51  ;;  %v636_v51 = vld [vmem:[%s1142_s5 + $0x58] sm:$0xff] }
   0xd   :  { %814 = vmatpush3.bf16.msra.mxu0 %v811_v8  ;;  %840 = vmatprep.subr.bf16.mxu1 %v839_v54  ;;  %v855_v52 = vpack.c.bf16 %v636_v51, %v635_v50 }
   0xe   :  { %816 = vmatprep.subr.bf16.mxu0 %v815_v12 }
  0x10   :  { %842 = vmatpush3.bf16.msra.mxu1 %v839_v54  ;;  %v646_v54 = vld [vmem:[%s1142_s5 + $0x68] sm:$0xff] }
  0x11   :  { %818 = vmatpush3.bf16.msra.mxu0 %v815_v12  ;;  %844 = vmatprep.subr.bf16.mxu1 %v843_v57  ;;  %v859_v55 = vpack.c.bf16 %v646_v54, %v645_v53 }
  0x12   :  { %820 = vmatprep.subr.bf16.mxu0 %v819_v15 }
  0x15   :  { %822 = vmatpush3.bf16.msra.mxu0 %v819_v15 }
  0x16   :  { %824 = vmatprep.subr.bf16.mxu0 %v823_v18 }
  0x19   :  { %826 = vmatpush3.bf16.msra.mxu0 %v823_v18 }
  0x1a   :  { %828 = vmatprep.subr.bf16.mxu0 %v827_v21 }
  0x1d   :  { %830 = vmatpush3.bf16.msra.mxu0 %v827_v21 }
  0x1e   :  { %832 = vmatprep.subr.bf16.mxu0 %v831_v24 }
  0x21   :  { %834 = vmatpush3.bf16.msra.mxu0 %v831_v24 }
  0x24   :  { %742 = vmatmul.mubr.f32.vlgmr.msra.gmra.mrb[0].mxu0 %v24_v25 }
  0x25   :  { %744 = vmatprep.mubr.f32.mxu0 %v25_v26  ;;  %v615_v26 = vld [vmem:[%s1143_s3] ss:$0 sm:$0xff] }
  0x28   :  { %745 = vmatmul.mubr.f32.gmra.mrb[2].mxu0 %v26_v27 }
  0xf7   :  { %v743_v29 = vpop.f32.mrb[0].mxu0 }
  0xf8   :  { %v973_v30 = vadd.f32 %v743_v29, %v614_v28  ;;  %v116_v31 = vpop.f32.mrb[1].mxu0 }
  0xf9   :  { %v975_v32 = vadd.f32 %v614_v28, %v116_v31 }
  0xfa   :  { %v139_v33 = vsel %vm135_vm0, %v973_v30, 0.0  ;;  %v154_v34 = vmul.f32 %v973_v30, %v973_v30 }
  0xfb   :  { %140 = vadd.xlane.f32.xlu0 %v139_v33  ;;  %v746_v35 = vpop.f32.mrb[2].mxu0  ;;  %v153_v38 = vmul.f32 %v975_v32, %v975_v32  ;;  %v136_v40 = vsel %vm135_vm0, %v975_v32, 0.0  ;;  %v616_v33 = vld [vmem:[%s1144_s4] ss:$0 sm:$0xff] }
  0xfc   :  { %v160_v36 = vsel %vm135_vm0, %v154_v34, 0.0  ;;  %v126_v37 = vpop.f32.mrb[3].mxu0  ;;  %v988_v41 = vadd.f32 %v746_v35, %v614_v28 }
  0xfd   :  { %161 = vadd.xlane.f32.xlu1 %v160_v36  ;;  %v984_v39 = vadd.f32 %v614_v28, %v126_v37  ;;  %v157_v42 = vsel %vm135_vm0, %v153_v38, 0.0 }
  0xfe   :  { %v145_v45 = vsel %vm135_vm0, %v988_v41, 0.0  ;;  %v156_v46 = vmul.f32 %v988_v41, %v988_v41 }
  0xff   :  { %137 = vadd.xlane.f32.xlu0 %v136_v40  ;;  %v142_v43 = vsel %vm135_vm0, %v984_v39, 0.0  ;;  %v155_v44 = vmul.f32 %v984_v39, %v984_v39 }
 0x100   :  { %v166_v48 = vsel %vm135_vm0, %v156_v46, 0.0 }
 0x101   :  { %158 = vadd.xlane.f32.xlu1 %v157_v42  ;;  %v163_v47 = vsel %vm135_vm0, %v155_v44, 0.0  ;;  %v634_v44 = vld [vmem:[%s1142_s5 + $0x48] sm:$0xff] }
 0x103   :  { %143 = vadd.xlane.f32.xlu0 %v142_v43  ;;  %v633_v43 = vld [vmem:[%s1142_s5 + $0x40] sm:$0xff] }
 0x105   :  { %146 = vadd.xlane.f32.xlu1 %v145_v45 }
 0x107   :  { %164 = vadd.xlane.f32.xlu0 %v163_v47  ;;  %v851_v47 = vpack.c.bf16 %v634_v44, %v633_v43 }
 0x109   :  { %167 = vadd.xlane.f32.xlu1 %v166_v48 }
 0x188   :  { %v141_v58 = vpop.xlane.xlu0 %140 }
 0x189   :  { %v150_v59 = vmul.f32 0.03125, %v141_v58 }
 0x18a   :  { %v162_v60 = vpop.xlane.xlu1 %161 }
 0x18b   :  { %v174_v61 = vmul.f32 %v150_v59, %v150_v59  ;;  %v170_v62 = vmul.f32 0.03125, %v162_v60  ;;  %v182_v22 = vsub.f32 %v973_v30, %v150_v59  ;;  %v623_v30 = vld [vmem:[%s1142_s5 + $0x30] sm:$0xff] }
 0x18c   :  { %v138_v63 = vpop.xlane.xlu0 %137 }
 0x18d   :  { %v178_v0 = vsub.f32 %v170_v62, %v174_v61  ;;  %v149_v1 = vmul.f32 0.03125, %v138_v63 }
 0x18e   :  { %v159_v2 = vpop.xlane.xlu1 %158 }
 0x18f   :  { %v186_v3 = vadd.f32 1e-05, %v178_v0  ;;  %v173_v4 = vmul.f32 %v149_v1, %v149_v1  ;;  %v169_v5 = vmul.f32 0.03125, %v159_v2  ;;  %v181_v25 = vsub.f32 %v975_v32, %v149_v1  ;;  %v624_v32 = vld [vmem:[%s1142_s5 + $0x38] sm:$0xff] }
 0x190   :  { %v144_v6 = vpop.xlane.xlu0 %143  ;;  %v847_v38 = vpack.c.bf16 %v624_v32, %v623_v30 }
 0x191   :  { %867 = vrsqrt.f32 %v186_v3  ;;  %v177_v7 = vsub.f32 %v169_v5, %v173_v4  ;;  %v151_v8 = vmul.f32 0.03125, %v144_v6 }
 0x192   :  { %v147_v9 = vpop.xlane.xlu1 %146 }
 0x193   :  { %v185_v10 = vadd.f32 1e-05, %v177_v7  ;;  %v152_v11 = vmul.f32 0.03125, %v147_v9  ;;  %v175_v13 = vmul.f32 %v151_v8, %v151_v8  ;;  %v183_v34 = vsub.f32 %v984_v39, %v151_v8 }
 0x194   :  { %v165_v12 = vpop.xlane.xlu0 %164 }
 0x195   :  { %869 = vrsqrt.f32 %v185_v10  ;;  %v171_v14 = vmul.f32 0.03125, %v165_v12  ;;  %v176_v16 = vmul.f32 %v152_v11, %v152_v11  ;;  %v184_v40 = vsub.f32 %v988_v41, %v152_v11 }
 0x196   :  { %v168_v15 = vpop.xlane.xlu1 %167 }
 0x197   :  { %v179_v17 = vsub.f32 %v171_v14, %v175_v13  ;;  %v172_v18 = vmul.f32 0.03125, %v168_v15 }
 0x199   :  { %v187_v19 = vadd.f32 1e-05, %v179_v17  ;;  %v180_v20 = vsub.f32 %v172_v18, %v176_v16 }
 0x19b   :  { %v868_v21 = vpop.eup %867  ;;  %871 = vrsqrt.f32 %v187_v19  ;;  %v188_v23 = vadd.f32 1e-05, %v180_v20 }
 0x19c   :  { %v194_v24 = vmul.f32 %v868_v21, %v182_v22 }
 0x19d   :  { %873 = vrsqrt.f32 %v188_v23 }
 0x19e   :  { %v205_v29 = vmul.f32 %v615_v26, %v194_v24 }
 0x19f   :  { %v870_v27 = vpop.eup %869 }
 0x1a0   :  { %v193_v28 = vmul.f32 %v870_v27, %v181_v25  ;;  %v216_v37 = vadd.f32 %v616_v33, %v205_v29 }
 0x1a2   :  { %v204_v31 = vmul.f32 %v615_v26, %v193_v28 }
 0x1a4   :  { %v215_v35 = vadd.f32 %v616_v33, %v204_v31 }
 0x1a5   :  { %v872_v36 = vpop.eup %871 }
 0x1a6   :  { %755 = vmatprep.mubr.msk.f32.mxu1 %vm135_vm0, %v215_v35  ;;  %v195_v42 = vmul.f32 %v872_v36, %v183_v34 }
 0x1a7   :  { %v874_v45 = vpop.eup %873  ;;  %756 = vmatmul.mubr.msk.f32.vlgmr.msra.gmra.mrb[0].mxu1 %vm135_vm0, %v216_v37 }
 0x1a8   :  { %846 = vmatpush3.bf16.msra.mxu1 %v843_v57  ;;  %v206_v39 = vmul.f32 %v615_v26, %v195_v42  ;;  %v196_v46 = vmul.f32 %v874_v45, %v184_v40  ;;  %v648_v57 = vld [vmem:[%s1142_s5 + $0x78] sm:$0xff] }
 0x1a9   :  { %848 = vmatprep.subr.bf16.mxu1 %v847_v38  ;;  %v863_v58 = vpack.c.bf16 %v648_v57, %v647_v56 }
 0x1aa   :  { %v217_v41 = vadd.f32 %v616_v33, %v206_v39  ;;  %v207_v48 = vmul.f32 %v615_v26, %v196_v46 }
 0x1ac   :  { %758 = vmatprep.mubr.msk.f32.mxu1 %vm135_vm0, %v217_v41  ;;  %v218_v49 = vadd.f32 %v616_v33, %v207_v48  ;;  %850 = vmatpush3.bf16.msra.mxu1 %v847_v38 }
 0x1ad   :  { %852 = vmatprep.subr.bf16.mxu1 %v851_v47 }
 0x1ae   :  { %759 = vmatmul.mubr.msk.f32.gmra.mrb[2].mxu1 %vm135_vm0, %v218_v49 }
 0x1af   :  { %769 = vmatprep.mubr.msk.f32.mxu1 %vm135_vm0, %v215_v35 }
 0x1b2   :  { %770 = vmatmul.mubr.msk.f32.vlgmr.msra.gmra.mrb[4].mxu1 %vm135_vm0, %v216_v37 }
 0x1b3   :  { %854 = vmatpush3.bf16.msra.mxu1 %v851_v47  ;;  %772 = vmatprep.mubr.msk.f32.mxu1 %vm135_vm0, %v217_v41 }
 0x1b4   :  { %856 = vmatprep.subr.bf16.mxu1 %v855_v52 }
 0x1b6   :  { %773 = vmatmul.mubr.msk.f32.gmra.mrb[6].mxu1 %vm135_vm0, %v218_v49 }
 0x1b7   :  { %858 = vmatpush3.bf16.msra.mxu1 %v855_v52  ;;  %783 = vmatprep.mubr.msk.f32.mxu1 %vm135_vm0, %v215_v35 }
 0x1b8   :  { %860 = vmatprep.subr.bf16.mxu1 %v859_v55 }
 0x1ba   :  { %784 = vmatmul.mubr.msk.f32.vlgmr.msra.gmra.mrb[8].mxu1 %vm135_vm0, %v216_v37 }
 0x1bb   :  { %862 = vmatpush3.bf16.msra.mxu1 %v859_v55  ;;  %786 = vmatprep.mubr.msk.f32.mxu1 %vm135_vm0, %v217_v41 }
 0x1bc   :  { %864 = vmatprep.subr.bf16.mxu1 %v863_v58 }
 0x1be   :  { %787 = vmatmul.mubr.msk.f32.gmra.mrb[10].mxu1 %vm135_vm0, %v218_v49 }
 0x1bf   :  { %866 = vmatpush3.bf16.msra.mxu1 %v863_v58  ;;  %797 = vmatprep.mubr.msk.f32.mxu1 %vm135_vm0, %v215_v35 }
 0x1c2   :  { %798 = vmatmul.mubr.msk.f32.vlgmr.msra.gmra.mrb[12].mxu1 %vm135_vm0, %v216_v37 }
 0x1c3   :  { %800 = vmatprep.mubr.msk.f32.mxu1 %vm135_vm0, %v217_v41 }
 0x1c6   :  { %801 = vmatmul.mubr.msk.f32.gmra.mrb[14].mxu1 %vm135_vm0, %v218_v49 }
 0x27a   :  { %v757_v59 = vpop.f32.mrb[0].mxu1 }
 0x27b   :  { %322 = vst.msk [vmem:[%s1145_s6 + $0x8] sm:$0xff] %vm320_vm1, %v757_v59  ;;  %v301_v60 = vpop.f32.mrb[1].mxu1 }
 0x27c   :  { %321 = vst.msk [vmem:[%s1145_s6] sm:$0xff] %vm320_vm1, %v301_v60 }
 0x281   :  { %v760_v61 = vpop.f32.mrb[2].mxu1 }
 0x282   :  { %324 = vst.msk [vmem:[%s1145_s6 + $0x18] sm:$0xff] %vm320_vm1, %v760_v61  ;;  %v311_v62 = vpop.f32.mrb[3].mxu1 }
 0x283   :  { %323 = vst.msk [vmem:[%s1145_s6 + $0x10] sm:$0xff] %vm320_vm1, %v311_v62 }
 0x285   :  { %v771_v63 = vpop.f32.mrb[4].mxu1 }
 0x286   :  { %630 = vst.msk [vmem:[%s1145_s6 + $0x28] sm:$0xff] %vm320_vm1, %v771_v63  ;;  %v396_v0 = vpop.f32.mrb[5].mxu1 }
 0x287   :  { %629 = vst.msk [vmem:[%s1145_s6 + $0x20] sm:$0xff] %vm320_vm1, %v396_v0 }
 0x289   :  { %v774_v1 = vpop.f32.mrb[6].mxu1 }
 0x28a   :  { %632 = vst.msk [vmem:[%s1145_s6 + $0x38] sm:$0xff] %vm320_vm1, %v774_v1  ;;  %v406_v2 = vpop.f32.mrb[7].mxu1 }
 0x28b   :  { %631 = vst.msk [vmem:[%s1145_s6 + $0x30] sm:$0xff] %vm320_vm1, %v406_v2 }
 0x28d   :  { %v785_v3 = vpop.f32.mrb[8].mxu1 }
 0x28e   :  { %642 = vst.msk [vmem:[%s1145_s6 + $0x48] sm:$0xff] %vm320_vm1, %v785_v3  ;;  %v491_v4 = vpop.f32.mrb[9].mxu1 }
 0x28f   :  { %641 = vst.msk [vmem:[%s1145_s6 + $0x40] sm:$0xff] %vm320_vm1, %v491_v4 }
 0x291   :  { %v788_v5 = vpop.f32.mrb[10].mxu1 }
 0x292   :  { %644 = vst.msk [vmem:[%s1145_s6 + $0x58] sm:$0xff] %vm320_vm1, %v788_v5  ;;  %v501_v6 = vpop.f32.mrb[11].mxu1 }
 0x293   :  { %643 = vst.msk [vmem:[%s1145_s6 + $0x50] sm:$0xff] %vm320_vm1, %v501_v6 }
 0x295   :  { %v799_v7 = vpop.f32.mrb[12].mxu1 }
 0x296   :  { %654 = vst.msk [vmem:[%s1145_s6 + $0x68] sm:$0xff] %vm320_vm1, %v799_v7  ;;  %v586_v8 = vpop.f32.mrb[13].mxu1 }
 0x297   :  { %653 = vst.msk [vmem:[%s1145_s6 + $0x60] sm:$0xff] %vm320_vm1, %v586_v8 }
 0x299   :  { %v802_v9 = vpop.f32.mrb[14].mxu1 }
 0x29a   :  { %656 = vst.msk [vmem:[%s1145_s6 + $0x78] sm:$0xff] %vm320_vm1, %v802_v9  ;;  %v596_v10 = vpop.f32.mrb[15].mxu1 }
 0x29b   :  { %655 = vst.msk [vmem:[%s1145_s6 + $0x70] sm:$0xff] %vm320_vm1, %v596_v10 }

// kernel: _lambda_.3
= control target key start
LH: loop header
LB: loop body
LE: loop exit
PB: predicated region body
PF: predicated region fallthrough
CT: control target
= control target key end

     0   :  { %s2251_s18 = smov 0   ;;  %s2253_s19 = smov 0   ;;  %s2550_s0 = inlined_call_operand.vmem [shape: f32[2,64,32], index: 0, kind: input, shape index: {}]   ;;  %s2551_s1 = inlined_call_operand.vmem [shape: f32[4,2,16,16], index: 1, kind: input, shape index: {}]   ;;  %s2552_s2 = inlined_call_operand.vmem [shape: f32[2,32,16], index: 2, kind: input, shape index: {}]   ;;  %s2553_s3 = inlined_call_operand.vmem [shape: f32[2,16,32], index: 3, kind: input, shape index: {}]   ;;  %s2554_s4 = inlined_call_operand.vmem [shape: f32[1,32], index: 4, kind: input, shape index: {}]   ;;  %s2555_s5 = inlined_call_operand.vmem [shape: f32[2,64,32], index: 5, kind: output, shape index: {}]  }
   0x1   :  { %s2255_s20 = smov 0   ;;  %s2257_s21 = smov 0  }
   0x2   :  { %s2259_s22 = smov 0  }
   0x3 LB: > { %s27_s23 = sadd.s32 1, %s2215_s21  ;;  %p69_p1 = scmp.ne.s32.totalorder %s2207_s19, %s2203_s18  ;;  %s2219_s22 = sphi %s2259_s22, %s15_s22   ;;  %s2215_s21 = sphi %s2257_s21, %s2561_s21   ;;  %s2211_s20 = sphi %s2255_s20, %s2560_s20   ;;  %s2207_s19 = sphi %s2253_s19, %s2559_s19   ;;  %s2203_s18 = sphi %s2251_s18, %s2558_s18  }
   0x4   : > { %p29_p0 = scmp.ge.s32.totalorder %s27_s23, 2  ;;  %p70_p2 = scmp.eq.s32.totalorder %s2219_s22, 0 }
   0x5   : > { %s62_s25 = sadd.s32 1, %s2207_s19  ;;  %p1709_p5 = scmp.ge.s32.totalorder %s2219_s22, 2 }
   0x6   : > { %s2563_s23 = smov (%p29_p0, %s27_s23), 0  ;;  %p71_p3 = por %p70_p2, %p69_p1 }
   0x7   : > { %s59_s24 = ssub.s32 %s2215_s21, %s2563_s23  ;;  %195 = sbr.rel (%p1709_p5) target bundleno = 22 (0x16), region = 28 }
   0x8   : > { %p60_p4 = scmp.eq.s32.totalorder %s59_s24, 0 }
   0xa   : > { %s2286_s26 = scalar_select %p60_p4, %s2207_s19, %s62_s25  }
   0xe   : > { %211 = sbr.rel (!%p71_p3) target bundleno = 22 (0x16), region = 36  ;;  %s213_s27 = sand.u32 (%p71_p3), 1, %s2207_s19  }
   0xf   : > { %s1802_s28 = sshll.u32 (%p71_p3), %s2215_s21, 4  ;;  %s1710_s29 = sshll.u32 (%p71_p3), %s213_s27, 6 }
  0x10   : > { %s218_s7 = scalar_lea.vmem (%p71_p3), %s2551_s1, %s1802_s28  ;;  %s215_s8 = scalar_lea.vmem (%p71_p3), [#allocation2], %s1710_s29 }
  0x11   : > { %v260_v0 = vld [vmem:[%s218_s7] sm:$0xff] (%p71_p3)  ;;  %v262_v1 = vld [vmem:[%s218_s7 + $0x8] sm:$0xff] (%p71_p3) }
  0x12   : > { %v264_v2 = vld [vmem:[%s218_s7 + $0x20] sm:$0xff] (%p71_p3)  ;;  %261 = vst [vmem:[%s215_s8] sm:$0xff] (%p71_p3), %v260_v0  ;;  %263 = vst [vmem:[%s215_s8 + $0x8] sm:$0xff] (%p71_p3), %v262_v1  ;;  %v266_v3 = vld [vmem:[%s218_s7 + $0x28] sm:$0xff] (%p71_p3) }
  0x13   : > { %265 = vst [vmem:[%s215_s8 + $0x10] sm:$0xff] (%p71_p3), %v264_v2  ;;  %v268_v4 = vld [vmem:[%s218_s7 + $0x40] sm:$0xff] (%p71_p3)  ;;  %v270_v5 = vld [vmem:[%s218_s7 + $0x48] sm:$0xff] (%p71_p3)  ;;  %267 = vst [vmem:[%s215_s8 + $0x18] sm:$0xff] (%p71_p3), %v266_v3 }
  0x14   : > { %269 = vst [vmem:[%s215_s8 + $0x20] sm:$0xff] (%p71_p3), %v268_v4  ;;  %271 = vst [vmem:[%s215_s8 + $0x28] sm:$0xff] (%p71_p3), %v270_v5  ;;  %v272_v6 = vld [vmem:[%s218_s7 + $0x60] sm:$0xff] (%p71_p3)  ;;  %v274_v7 = vld [vmem:[%s218_s7 + $0x68] sm:$0xff] (%p71_p3) }
  0x15   : > { %273 = vst [vmem:[%s215_s8 + $0x30] sm:$0xff] %v272_v6  ;;  %275 = vst [vmem:[%s215_s8 + $0x38] sm:$0xff] %v274_v7 }
  0x16 PF: > { %p1713_p6 = scmp.ge.s32.totalorder %s2219_s22, 1  ;;  %p280_p7 = scmp.lt.s32.totalorder %s2219_s22, 3 }
  0x18   : > { %p281_p8 = pnand %p1713_p6, %p280_p7 }
  0x19   : > { %v355_v8 = vld [vmem:[%s2552_s2] sm:$0xff] (!%p281_p8)  ;;  %v356_v9 = vld [vmem:[%s2552_s2 + $0x8] sm:$0xff] (!%p281_p8)  ;;  %v357_v10 = vld [vmem:[%s2552_s2 + $0x10] sm:$0xff] (!%p281_p8)  ;;  %p328_p9 = scmp.lt.s32.totalorder (!%p281_p8), %s2211_s20, 1  ;;  %s287_s15 = sand.u32 (!%p281_p8), 1, %s2203_s18   ;;  %vm494_vm0 = vcmask (!%p281_p8), 130048  }
  0x1a   : > { %284 = sbr.rel (%p281_p8) target bundleno = 1475 (0x5c3), region = 74  ;;  %v2025_v11 = vpack.c.bf16 (!%p281_p8), %v356_v9, %v355_v8  ;;  %v358_v12 = vld [vmem:[%s2552_s2 + $0x18] sm:$0xff] (!%p281_p8)  ;;  %s1714_s24 = sshll.u32 (!%p281_p8), %s287_s15, 6  ;;  %vm359_vm1 = vcmask (!%p281_p8), 261120   ;;  %vm2325_vm2 = vmpackc.low (!%p281_p8), %vm494_vm0, %vm494_vm0  ;;  %v1747_v26 = vld [vmem:[%s2552_s2 + $0x20] sm:$0xff] (!%p281_p8) }
  0x1b   : > { %v2029_v13 = vpack.c.bf16 (!%p281_p8), %v358_v12, %v357_v10  ;;  %s2314_s27 = scalar_lea.vmem (!%p281_p8), [#allocation2], %s1714_s24  ;;  %v1748_v27 = vld [vmem:[%s2552_s2 + $0x28] sm:$0xff] (!%p281_p8)  ;;  %v1749_v29 = vld [vmem:[%s2552_s2 + $0x30] sm:$0xff] (!%p281_p8)  ;;  %v1750_v30 = vld [vmem:[%s2552_s2 + $0x38] sm:$0xff] (!%p281_p8) }
  0x1c   : > { %2026 = vmatprep.subr.bf16.mxu1 (!%p281_p8), %v2025_v11  ;;  %v489_v14 = vld [vmem:[%s2314_s27] sm:$0xff] (!%p281_p8)  ;;  %v490_v15 = vld [vmem:[%s2314_s27 + $0x8] sm:$0xff] (!%p281_p8)  ;;  %v2043_v28 = vpack.c.bf16 (!%p281_p8), %v1748_v27, %v1747_v26  ;;  %v2047_v33 = vpack.c.bf16 (!%p281_p8), %v1750_v30, %v1749_v29  ;;  %v1759_v59 = vld [vmem:[%s2314_s27 + $0x10] sm:$0xff] (!%p281_p8) }
  0x1d   : > { %2028 = vmatpush3.bf16.msra.mxu1 (!%p281_p8), %v2025_v11  ;;  %v2033_v16 = vpack.c.bf16 (!%p281_p8), %v490_v15, %v489_v14  ;;  %v1727_v56 = vld [vmem:[%s2314_s27 + $0x20] sm:$0xff] (!%p281_p8)  ;;  %v1728_v57 = vld [vmem:[%s2314_s27 + $0x28] sm:$0xff] (!%p281_p8)  ;;  %v1760_v60 = vld [vmem:[%s2314_s27 + $0x18] sm:$0xff] (!%p281_p8) }
  0x1e   : > { %2030 = vmatprep.subr.bf16.mxu1 (!%p281_p8), %v2029_v13  ;;  %v2039_v58 = vpack.c.bf16 (!%p281_p8), %v1728_v57, %v1727_v56  ;;  %v2051_v61 = vpack.c.bf16 (!%p281_p8), %v1760_v60, %v1759_v59 }
  0x20   : > { %2040 = vmatprep.subr.bf16.mxu0 (!%p281_p8), %v2039_v58 }
  0x21   : > { %s2565_s20 = smov (!%p328_p9, %s2211_s20), 1  ;;  %2032 = vmatpush3.bf16.msra.mxu1 %v2029_v13  ;;  %2042 = vmatpush3.bf16.msra.mxu0 %v2039_v58 }
  0x22   : > { %s1803_s25 = sshll.u32 %s2565_s20, 6  ;;  %2035 = vmatprep.subr.msk.bf16.mxu1 %vm2325_vm2, %v2033_v16  ;;  %2053 = vmatprep.subr.msk.bf16.mxu0 %vm2325_vm2, %v2051_v61 }
  0x23   : > { %s335_s29 = scalar_lea.vmem %s2550_s0, %s1803_s25  ;;  %s345_s7 = scalar_lea.vmem %s2555_s5, %s1803_s25 }
  0x24   : > { %v347_v17 = vld [vmem:[%s335_s29] sm:$0xff]  ;;  %v348_v19 = vld [vmem:[%s335_s29 + $0x8] sm:$0xff]  ;;  %v349_v20 = vld [vmem:[%s335_s29 + $0x10] sm:$0xff] }
  0x25   : > { %1897 = vmatprep.mubr.msk.f32.mxu1 %vm359_vm1, %v347_v17  ;;  %v350_v21 = vld [vmem:[%s335_s29 + $0x18] sm:$0xff]  ;;  %v351_v22 = vld [vmem:[%s335_s29 + $0x20] sm:$0xff]  ;;  %v352_v23 = vld [vmem:[%s335_s29 + $0x28] sm:$0xff] }
  0x26   : > { %1898 = vmatmul.mubr.msk.f32.vlgmr.msra.gmra.mrb[0].mxu1 %vm359_vm1, %v348_v19  ;;  %v353_v24 = vld [vmem:[%s335_s29 + $0x30] sm:$0xff]  ;;  %v354_v25 = vld [vmem:[%s335_s29 + $0x38] sm:$0xff] }
  0x27   : > { %1900 = vmatprep.mubr.msk.f32.mxu1 %vm359_vm1, %v349_v20 }
  0x2a   : > { %1901 = vmatmul.mubr.msk.f32.gmra.mrb[2].mxu1 %vm359_vm1, %v350_v21 }
  0x2b   : > { %1903 = vmatprep.mubr.msk.f32.mxu1 %vm359_vm1, %v351_v22  ;;  %2038 = vmatpush3.bf16.xpose.msk.msra.mxu1 %vm2325_vm2, %v2033_v16 }
  0x2c   : > { %2044 = vmatprep.subr.bf16.mxu1 %v2043_v28 }
  0x2e   : > { %1904 = vmatmul.mubr.msk.f32.gmra.mrb[4].mxu1 %vm359_vm1, %v352_v23 }
  0x2f   : > { %1906 = vmatprep.mubr.msk.f32.mxu1 %vm359_vm1, %v353_v24 }
  0x32   : > { %1907 = vmatmul.mubr.msk.f32.gmra.mrb[6].mxu1 %vm359_vm1, %v354_v25 }
  0xf9   : > { %v1899_v31 = vpop.f32.mrb[0].mxu1 }
  0xfa   : > { %v450_v32 = vpop.f32.mrb[1].mxu1 }
  0xfb   : > { %1913 = vmatprep.mubr.msk.f32.mxu1 %vm494_vm0, %v450_v32 }
  0xfc   : > { %1914 = vmatmul.mubr.msk.f32.vlgmr.msra.gmra.mrb[8].mxu1 %vm494_vm0, %v1899_v31 }
  0xfd   : > { %v1902_v34 = vpop.f32.mrb[2].mxu1  ;;  %2046 = vmatpush3.bf16.msra.mxu1 %v2043_v28 }
  0xfe   : > { %v460_v35 = vpop.f32.mrb[3].mxu1  ;;  %2048 = vmatprep.subr.bf16.mxu1 %v2047_v33 }
  0xff   : > { %1916 = vmatprep.mubr.msk.f32.mxu1 %vm494_vm0, %v460_v35 }
 0x100   : > { %1917 = vmatmul.mubr.msk.f32.gmra.mrb[10].mxu1 %vm494_vm0, %v1902_v34 }
 0x101   : > { %v1905_v36 = vpop.f32.mrb[4].mxu1  ;;  %2050 = vmatpush3.bf16.msra.mxu1 %v2047_v33 }
 0x102   : > { %v470_v37 = vpop.f32.mrb[5].mxu1 }
 0x103   : > { %1919 = vmatprep.mubr.msk.f32.mxu1 %vm494_vm0, %v470_v37 }
 0x104   : > { %1920 = vmatmul.mubr.msk.f32.gmra.mrb[12].mxu1 %vm494_vm0, %v1905_v36 }
 0x105   : > { %v1908_v38 = vpop.f32.mrb[6].mxu1 }
 0x106   : > { %v480_v39 = vpop.f32.mrb[7].mxu1 }
 0x107   : > { %1922 = vmatprep.mubr.msk.f32.mxu1 %vm494_vm0, %v480_v39 }
 0x108   : > { %1923 = vmatmul.mubr.msk.f32.gmra.mrb[14].mxu1 %vm494_vm0, %v1908_v38 }
 0x109   : > { %1949 = vmatprep.mubr.msk.f32.mxu1 %vm359_vm1, %v347_v17 }
 0x10c   : > { %1950 = vmatmul.mubr.msk.f32.vlgmr.msra.gmra.mrb[16].mxu1 %vm359_vm1, %v348_v19 }
 0x10d   : > { %1952 = vmatprep.mubr.msk.f32.mxu1 %vm359_vm1, %v349_v20 }
 0x110   : > { %1953 = vmatmul.mubr.msk.f32.gmra.mrb[18].mxu1 %vm359_vm1, %v350_v21 }
 0x111   : > { %1955 = vmatprep.mubr.msk.f32.mxu1 %vm359_vm1, %v351_v22 }
 0x114   : > { %1956 = vmatmul.mubr.msk.f32.gmra.mrb[20].mxu1 %vm359_vm1, %v352_v23 }
 0x115   : > { %1958 = vmatprep.mubr.msk.f32.mxu1 %vm359_vm1, %v353_v24 }
 0x118   : > { %1959 = vmatmul.mubr.msk.f32.gmra.mrb[22].mxu1 %vm359_vm1, %v354_v25 }
 0x1cf   : > { %v1915_v40 = vpop.f32.mrb[8].mxu1 }
 0x1d0   : > { %v591_v41 = vpop.f32.mrb[9].mxu1  ;;  %v633_v45 = vsel %vm494_vm0, %v1915_v40, -inf }
 0x1d1   : > { %v630_v42 = vsel %vm494_vm0, %v591_v41, -inf }
 0x1d2   : > { %631 = vmax.xlane.f32.xlu0 %v630_v42 }
 0x1d3   : > { %v1918_v43 = vpop.f32.mrb[10].mxu1 }
 0x1d4   : > { %v601_v44 = vpop.f32.mrb[11].mxu1  ;;  %v639_v49 = vsel %vm494_vm0, %v1918_v43, -inf }
 0x1d5   : > { %v636_v46 = vsel %vm494_vm0, %v601_v44, -inf }
 0x1d6   : > { %634 = vmax.xlane.f32.xlu0 %v633_v45  ;;  %637 = vmax.xlane.f32.xlu1 %v636_v46 }
 0x1d7   : > { %v1921_v47 = vpop.f32.mrb[12].mxu1 }
 0x1d8   : > { %v611_v48 = vpop.f32.mrb[13].mxu1  ;;  %v645_v53 = vsel %vm494_vm0, %v1921_v47, -inf }
 0x1d9   : > { %v642_v50 = vsel %vm494_vm0, %v611_v48, -inf }
 0x1da   : > { %640 = vmax.xlane.f32.xlu1 %v639_v49  ;;  %643 = vmax.xlane.f32.xlu0 %v642_v50 }
 0x1db   : > { %v1924_v51 = vpop.f32.mrb[14].mxu1 }
 0x1dc   : > { %v621_v52 = vpop.f32.mrb[15].mxu1  ;;  %v651_v55 = vsel %vm494_vm0, %v1924_v51, -inf }
 0x1dd   : > { %v648_v54 = vsel %vm494_vm0, %v621_v52, -inf }
 0x1de   : > { %646 = vmax.xlane.f32.xlu1 %v645_v53  ;;  %649 = vmax.xlane.f32.xlu0 %v648_v54 }
 0x1df   : > { %v1951_v62 = vpop.f32.mrb[16].mxu1 }
 0x1e0   : > { %v920_v63 = vpop.f32.mrb[17].mxu1 }
 0x1e2   : > { %652 = vmax.xlane.f32.xlu1 %v651_v55 }
 0x1e3   : > { %v1954_v0 = vpop.f32.mrb[18].mxu1 }
 0x1e4   : > { %v930_v1 = vpop.f32.mrb[19].mxu1 }
 0x1e7   : > { %v1957_v2 = vpop.f32.mrb[20].mxu1 }
 0x1e8   : > { %v940_v3 = vpop.f32.mrb[21].mxu1 }
 0x1eb   : > { %v1960_v4 = vpop.f32.mrb[22].mxu1 }
 0x1ec   : > { %v950_v5 = vpop.f32.mrb[23].mxu1 }
 0x25f   : > { %v632_v6 = vpop.xlane.xlu0 %631 }
 0x260   : > { %v654_v7 = vsub.f32 %v591_v41, %v632_v6 }
 0x262   : > { %v662_v8 = vmul.f32 1.442695, %v654_v7 }
 0x263   : > { %v635_v9 = vpop.xlane.xlu0 %634  ;;  %v638_v10 = vpop.xlane.xlu1 %637 }
 0x264   : > { %2117 = vpow2.f32 %v662_v8  ;;  %v655_v11 = vsub.f32 %v1915_v40, %v635_v9  ;;  %v656_v12 = vsub.f32 %v601_v44, %v638_v10 }
 0x266   : > { %v664_v13 = vmul.f32 1.442695, %v655_v11  ;;  %v666_v14 = vmul.f32 1.442695, %v656_v12 }
 0x267   : > { %v641_v15 = vpop.xlane.xlu1 %640  ;;  %v644_v16 = vpop.xlane.xlu0 %643 }
 0x268   : > { %2119 = vpow2.f32 %v664_v13  ;;  %v657_v17 = vsub.f32 %v1918_v43, %v641_v15  ;;  %v658_v19 = vsub.f32 %v611_v48, %v644_v16 }
 0x269   : > { %2121 = vpow2.f32 %v666_v14 }
 0x26a   : > { %v668_v20 = vmul.f32 1.442695, %v657_v17  ;;  %v670_v21 = vmul.f32 1.442695, %v658_v19 }
 0x26b   : > { %v647_v22 = vpop.xlane.xlu1 %646  ;;  %v650_v23 = vpop.xlane.xlu0 %649 }
 0x26c   : > { %2123 = vpow2.f32 %v668_v20  ;;  %v659_v24 = vsub.f32 %v1921_v47, %v647_v22  ;;  %v660_v25 = vsub.f32 %v621_v52, %v650_v23 }
 0x26d   : > { %2125 = vpow2.f32 %v670_v21 }
 0x26e   : > { %v2383_v26 = vpop.eup %2117  ;;  %v672_v27 = vmul.f32 1.442695, %v659_v24  ;;  %v674_v28 = vmul.f32 1.442695, %v660_v25 }
 0x26f   : > { %1929 = vmatprep.mubr.msk.f32.mxu0 %vm494_vm0, %v2383_v26  ;;  %v653_v29 = vpop.xlane.xlu1 %652 }
 0x270   : > { %2127 = vpow2.f32 %v672_v27  ;;  %v661_v30 = vsub.f32 %v1924_v51, %v653_v29 }
 0x271   : > { %2129 = vpow2.f32 %v674_v28 }
 0x272   : > { %v2387_v31 = vpop.eup %2119  ;;  %v676_v32 = vmul.f32 1.442695, %v661_v30 }
 0x273   : > { %v2389_v33 = vpop.eup %2121  ;;  %1930 = vmatmul.mubr.msk.f32.vlgmr.msra.gmra.mrb[0].mxu0 %vm494_vm0, %v2387_v31 }
 0x274   : > { %2131 = vpow2.f32 %v676_v32  ;;  %2056 = vmatpush3.bf16.xpose.msk.msra.mxu0 %vm2325_vm2, %v2051_v61  ;;  %1932 = vmatprep.mubr.msk.f32.mxu0 %vm494_vm0, %v2389_v33 }
 0x276   : > { %v2397_v34 = vpop.eup %2123 }
 0x277   : > { %v2399_v35 = vpop.eup %2125  ;;  %1933 = vmatmul.mubr.msk.f32.gmra.mrb[2].mxu0 %vm494_vm0, %v2397_v34 }
 0x278   : > { %1935 = vmatprep.mubr.msk.f32.mxu0 %vm494_vm0, %v2399_v35 }
 0x27a   : > { %v2405_v36 = vpop.eup %2127 }
 0x27b   : > { %v2407_v37 = vpop.eup %2129  ;;  %1936 = vmatmul.mubr.msk.f32.gmra.mrb[4].mxu0 %vm494_vm0, %v2405_v36 }
 0x27c   : > { %1938 = vmatprep.mubr.msk.f32.mxu0 %vm494_vm0, %v2407_v37 }
 0x27e   : > { %v2413_v18 = vpop.eup %2131 }
 0x27f   : > { %1939 = vmatmul.mubr.msk.f32.gmra.mrb[6].mxu0 %vm494_vm0, %v2413_v18 }
 0x280   : > { %1965 = vmatprep.mubr.msk.f32.mxu0 %vm494_vm0, %v920_v63  ;;  %v1762_v63 = vld [vmem:[%s2314_s27 + $0x38] sm:$0xff] }
 0x283   : > { %1966 = vmatmul.mubr.msk.f32.vlgmr.msra.gmra.mrb[8].mxu0 %vm494_vm0, %v1951_v62  ;;  %v1761_v62 = vld [vmem:[%s2314_s27 + $0x30] sm:$0xff] }
 0x284   : > { %1968 = vmatprep.mubr.msk.f32.mxu0 %vm494_vm0, %v930_v1 }
 0x287   : > { %1969 = vmatmul.mubr.msk.f32.gmra.mrb[10].mxu0 %vm494_vm0, %v1954_v0  ;;  %v2057_v0 = vpack.c.bf16 %v1762_v63, %v1761_v62 }
 0x288   : > { %1971 = vmatprep.mubr.msk.f32.mxu0 %vm494_vm0, %v940_v3 }
 0x289   : > { %2058 = vmatprep.subr.bf16.mxu1 %v2057_v0 }
 0x28a   : > { %2060 = vmatpush3.bf16.msra.mxu1 %v2057_v0 }
 0x28b   : > { %1972 = vmatmul.mubr.msk.f32.gmra.mrb[12].mxu0 %vm494_vm0, %v1957_v2 }
 0x28c   : > { %1974 = vmatprep.mubr.msk.f32.mxu0 %vm494_vm0, %v950_v5 }
 0x28f   : > { %1975 = vmatmul.mubr.msk.f32.gmra.mrb[14].mxu0 %vm494_vm0, %v1960_v4 }
 0x346   : > { %v2425_v38 = vpop.f32.mrb[0].mxu0 }
 0x347   : > { %v2427_v39 = vpop.f32.mrb[1].mxu0 }
 0x34a   : > { %v2429_v40 = vpop.f32.mrb[2].mxu0 }
 0x34b   : > { %v2431_v41 = vpop.f32.mrb[3].mxu0 }
 0x34e   : > { %v2433_v42 = vpop.f32.mrb[4].mxu0 }
 0x34f   : > { %v2435_v43 = vpop.f32.mrb[5].mxu0 }
 0x352   : > { %v2437_v44 = vpop.f32.mrb[6].mxu0 }
 0x353   : > { %v2439_v45 = vpop.f32.mrb[7].mxu0 }
 0x356   : > { %v1967_v46 = vpop.f32.mrb[8].mxu0 }
 0x357   : > { %v1061_v47 = vpop.f32.mrb[9].mxu0  ;;  %v1103_v48 = vsel %vm494_vm0, %v1967_v46, -inf }
 0x358   : > { %1104 = vmax.xlane.f32.xlu1 %v1103_v48  ;;  %v1100_v49 = vsel %vm494_vm0, %v1061_v47, -inf }
 0x359   : > { %1101 = vmax.xlane.f32.xlu0 %v1100_v49 }
 0x35a   : > { %v1970_v50 = vpop.f32.mrb[10].mxu0 }
 0x35b   : > { %v1071_v51 = vpop.f32.mrb[11].mxu0  ;;  %v1109_v52 = vsel %vm494_vm0, %v1970_v50, -inf }
 0x35c   : > { %1110 = vmax.xlane.f32.xlu1 %v1109_v52  ;;  %v1106_v53 = vsel %vm494_vm0, %v1071_v51, -inf }
 0x35d   : > { %1107 = vmax.xlane.f32.xlu0 %v1106_v53 }
 0x35e   : > { %v1973_v54 = vpop.f32.mrb[12].mxu0 }
 0x35f   : > { %v1081_v55 = vpop.f32.mrb[13].mxu0  ;;  %v1115_v56 = vsel %vm494_vm0, %v1973_v54, -inf }
 0x360   : > { %1116 = vmax.xlane.f32.xlu1 %v1115_v56  ;;  %v1112_v57 = vsel %vm494_vm0, %v1081_v55, -inf }
 0x361   : > { %1113 = vmax.xlane.f32.xlu0 %v1112_v57  ;;  %v681_v57 = vsel %vm494_vm0, %v2387_v31, 0.0  ;;  %v690_v31 = vsel %vm494_vm0, %v2399_v35, 0.0  ;;  %v847_v35 = vld [vmem:[%s2553_s3] sm:$0xff] }
 0x362   : > { %v1976_v58 = vpop.f32.mrb[14].mxu0 }
 0x363   : > { %v1091_v59 = vpop.f32.mrb[15].mxu0  ;;  %v1121_v60 = vsel %vm494_vm0, %v1976_v58, -inf }
 0x364   : > { %1122 = vmax.xlane.f32.xlu1 %v1121_v60  ;;  %v1118_v61 = vsel %vm494_vm0, %v1091_v59, -inf  ;;  %v684_v60 = vsel %vm494_vm0, %v2389_v33, 0.0  ;;  %v1781_v33 = vld [vmem:[%s2553_s3 + $0x10] sm:$0xff] }
 0x365   : > { %1119 = vmax.xlane.f32.xlu0 %v1118_v61  ;;  %v693_v61 = vsel %vm494_vm0, %v2405_v36, 0.0  ;;  %v1782_v36 = vld [vmem:[%s2553_s3 + $0x18] sm:$0xff] }
 0x366   : > { %v2061_v62 = vpack.c.bf16 %v1782_v36, %v1781_v33 }
 0x368   : > { %2062 = vmatprep.subr.bf16.mxu0 %v2061_v62 }
 0x369   : > { %2064 = vmatpush3.bf16.msra.mxu0 %v2061_v62 }
 0x3e5   : > { %v1105_v1 = vpop.xlane.xlu1 %1104 }
 0x3e6   : > { %v1125_v2 = vsub.f32 %v1967_v46, %v1105_v1  ;;  %v1102_v3 = vpop.xlane.xlu0 %1101 }
 0x3e7   : > { %v1124_v4 = vsub.f32 %v1061_v47, %v1102_v3 }
 0x3e8   : > { %v1134_v5 = vmul.f32 1.442695, %v1125_v2 }
 0x3e9   : > { %v1132_v6 = vmul.f32 1.442695, %v1124_v4  ;;  %v1111_v7 = vpop.xlane.xlu1 %1110 }
 0x3ea   : > { %2133 = vpow2.f32 %v1134_v5  ;;  %v1127_v8 = vsub.f32 %v1970_v50, %v1111_v7  ;;  %v1108_v9 = vpop.xlane.xlu0 %1107 }
 0x3eb   : > { %2135 = vpow2.f32 %v1132_v6  ;;  %v1126_v10 = vsub.f32 %v1071_v51, %v1108_v9 }
 0x3ec   : > { %v1138_v11 = vmul.f32 1.442695, %v1127_v8 }
 0x3ed   : > { %v1136_v12 = vmul.f32 1.442695, %v1126_v10  ;;  %v1117_v13 = vpop.xlane.xlu1 %1116 }
 0x3ee   : > { %2137 = vpow2.f32 %v1138_v11  ;;  %v1129_v14 = vsub.f32 %v1973_v54, %v1117_v13  ;;  %v1114_v15 = vpop.xlane.xlu0 %1113 }
 0x3ef   : > { %2139 = vpow2.f32 %v1136_v12  ;;  %v1128_v16 = vsub.f32 %v1081_v55, %v1114_v15 }
 0x3f0   : > { %v1142_v17 = vmul.f32 1.442695, %v1129_v14 }
 0x3f1   : > { %v1140_v19 = vmul.f32 1.442695, %v1128_v16  ;;  %v1123_v20 = vpop.xlane.xlu1 %1122 }
 0x3f2   : > { %2141 = vpow2.f32 %v1142_v17  ;;  %v1131_v21 = vsub.f32 %v1976_v58, %v1123_v20  ;;  %v1120_v22 = vpop.xlane.xlu0 %1119  ;;  %v678_v58 = vsel %vm494_vm0, %v2383_v26, 0.0  ;;  %v699_v26 = vsel %vm494_vm0, %v2413_v18, 0.0 }
 0x3f3   : > { %2143 = vpow2.f32 %v1140_v19  ;;  %v1130_v23 = vsub.f32 %v1091_v59, %v1120_v22  ;;  %v687_v59 = vsel %vm494_vm0, %v2397_v34, 0.0  ;;  %v696_v34 = vsel %vm494_vm0, %v2407_v37, 0.0  ;;  %v848_v37 = vld [vmem:[%s2553_s3 + $0x8] sm:$0xff] }
 0x3f4   : > { %v2134_v24 = vpop.eup %2133  ;;  %v1146_v25 = vmul.f32 1.442695, %v1131_v21  ;;  %v2065_v18 = vpack.c.bf16 %v848_v37, %v847_v35 }
 0x3f5   : > { %v2136_v27 = vpop.eup %2135  ;;  %v1144_v28 = vmul.f32 1.442695, %v1130_v23  ;;  %v1151_v29 = vsel %vm494_vm0, %v2134_v24, 0.0 }
 0x3f6   : > { %2145 = vpow2.f32 %v1146_v25  ;;  %1981 = vmatprep.mubr.msk.f32.mxu1 %vm494_vm0, %v2136_v27  ;;  %1152 = vadd.xlane.f32.xlu1 %v1151_v29  ;;  %v1148_v30 = vsel %vm494_vm0, %v2136_v27, 0.0 }
 0x3f7   : > { %2147 = vpow2.f32 %v1144_v28  ;;  %1982 = vmatmul.mubr.msk.f32.vlgmr.msra.gmra.mrb[24].mxu1 %vm494_vm0, %v2134_v24  ;;  %1149 = vadd.xlane.f32.xlu0 %v1148_v30 }
 0x3f8   : > { %v2138_v32 = vpop.eup %2137  ;;  %2066 = vmatprep.subr.bf16.mxu0 %v2065_v18 }
 0x3f9   : > { %v2140_v46 = vpop.eup %2139  ;;  %v1157_v47 = vsel %vm494_vm0, %v2138_v32, 0.0 }
 0x3fa   : > { %1984 = vmatprep.mubr.msk.f32.mxu1 %vm494_vm0, %v2140_v46  ;;  %1158 = vadd.xlane.f32.xlu1 %v1157_v47  ;;  %v1154_v48 = vsel %vm494_vm0, %v2140_v46, 0.0 }
 0x3fb   : > { %1985 = vmatmul.mubr.msk.f32.gmra.mrb[26].mxu1 %vm494_vm0, %v2138_v32  ;;  %1155 = vadd.xlane.f32.xlu0 %v1154_v48 }
 0x3fc   : > { %v2142_v49 = vpop.eup %2141 }
 0x3fd   : > { %v2144_v50 = vpop.eup %2143  ;;  %v1163_v51 = vsel %vm494_vm0, %v2142_v49, 0.0 }
 0x3fe   : > { %1987 = vmatprep.mubr.msk.f32.mxu1 %vm494_vm0, %v2144_v50  ;;  %1164 = vadd.xlane.f32.xlu1 %v1163_v51  ;;  %v1160_v52 = vsel %vm494_vm0, %v2144_v50, 0.0 }
 0x3ff   : > { %1988 = vmatmul.mubr.msk.f32.gmra.mrb[28].mxu1 %vm494_vm0, %v2142_v49  ;;  %1161 = vadd.xlane.f32.xlu0 %v1160_v52 }
 0x400   : > { %v2146_v53 = vpop.eup %2145 }
 0x401   : > { %v2148_v54 = vpop.eup %2147  ;;  %v1169_v55 = vsel %vm494_vm0, %v2146_v53, 0.0 }
 0x402   : > { %1170 = vadd.xlane.f32.xlu1 %v1169_v55  ;;  %1990 = vmatprep.mubr.msk.f32.mxu1 %vm494_vm0, %v2148_v54  ;;  %v1166_v56 = vsel %vm494_vm0, %v2148_v54, 0.0 }
 0x403   : > { %1991 = vmatmul.mubr.msk.f32.gmra.mrb[30].mxu1 %vm494_vm0, %v2146_v53  ;;  %1167 = vadd.xlane.f32.xlu0 %v1166_v56 }
 0x406   : > { %682 = vadd.xlane.f32.xlu1 %v681_v57 }
 0x407   : > { %679 = vadd.xlane.f32.xlu0 %v678_v58 }
 0x40a   : > { %688 = vadd.xlane.f32.xlu1 %v687_v59 }
 0x40b   : > { %685 = vadd.xlane.f32.xlu0 %v684_v60 }
 0x40e   : > { %694 = vadd.xlane.f32.xlu1 %v693_v61 }
 0x40f   : > { %691 = vadd.xlane.f32.xlu0 %v690_v31 }
 0x412   : > { %700 = vadd.xlane.f32.xlu1 %v699_v26 }
 0x413   : > { %697 = vadd.xlane.f32.xlu0 %v696_v34 }
 0x483   : > { %v1153_v0 = vpop.xlane.xlu1 %1152 }
 0x484   : > { %v1150_v63 = vpop.xlane.xlu0 %1149 }
 0x485   : > { %2149 = vrcp.f32 %v1150_v63 }
 0x486   : > { %2151 = vrcp.f32 %v1153_v0 }
 0x487   : > { %v1159_v2 = vpop.xlane.xlu1 %1158 }
 0x488   : > { %v1156_v1 = vpop.xlane.xlu0 %1155 }
 0x489   : > { %2153 = vrcp.f32 %v1156_v1 }
 0x48a   : > { %2155 = vrcp.f32 %v1159_v2 }
 0x48b   : > { %v1165_v4 = vpop.xlane.xlu1 %1164 }
 0x48c   : > { %v1162_v3 = vpop.xlane.xlu0 %1161 }
 0x48d   : > { %2157 = vrcp.f32 %v1162_v3 }
 0x48e   : > { %2159 = vrcp.f32 %v1165_v4 }
 0x48f   : > { %v1171_v6 = vpop.xlane.xlu1 %1170  ;;  %v2150_v11 = vpop.eup %2149 }
 0x490   : > { %v1168_v5 = vpop.xlane.xlu0 %1167  ;;  %v2152_v13 = vpop.eup %2151 }
 0x491   : > { %2161 = vrcp.f32 %v1168_v5 }
 0x493   : > { %v683_v8 = vpop.xlane.xlu1 %682  ;;  %v2154_v19 = vpop.eup %2153 }
 0x494   : > { %v680_v7 = vpop.xlane.xlu0 %679  ;;  %v2156_v21 = vpop.eup %2155 }
 0x495   : > { %2163 = vrcp.f32 %v680_v7 }
 0x496   : > { %2165 = vrcp.f32 %v1171_v6 }
 0x497   : > { %v689_v15 = vpop.xlane.xlu1 %688  ;;  %2167 = vrcp.f32 %v683_v8  ;;  %v2158_v27 = vpop.eup %2157 }
 0x498   : > { %v686_v9 = vpop.xlane.xlu0 %685  ;;  %v2160_v30 = vpop.eup %2159 }
 0x499   : > { %2169 = vrcp.f32 %v686_v9 }
 0x49a   : > { %2171 = vrcp.f32 %v689_v15 }
 0x49b   : > { %v695_v28 = vpop.xlane.xlu1 %694  ;;  %v2162_v47 = vpop.eup %2161 }
 0x49c   : > { %v692_v22 = vpop.xlane.xlu0 %691 }
 0x49d   : > { %2173 = vrcp.f32 %v692_v22 }
 0x49e   : > { %2175 = vrcp.f32 %v695_v28 }
 0x49f   : > { %v2164_v50 = vpop.eup %2163  ;;  %v701_v54 = vpop.xlane.xlu1 %700 }
 0x4a0   : > { %v698_v48 = vpop.xlane.xlu0 %697  ;;  %v2166_v52 = vpop.eup %2165  ;;  %v839_v57 = vmul.f32 %v2164_v50, %v2427_v39 }
 0x4a1   : > { %2177 = vrcp.f32 %v698_v48  ;;  %v2168_v56 = vpop.eup %2167 }
 0x4a2   : > { %2179 = vrcp.f32 %v701_v54  ;;  %v840_v59 = vmul.f32 %v2168_v56, %v2425_v38 }
 0x4a3   : > { %v2170_v58 = vpop.eup %2169 }
 0x4a4   : > { %v2172_v60 = vpop.eup %2171  ;;  %v841_v61 = vmul.f32 %v2170_v58, %v2431_v41 }
 0x4a5   : > { %v842_v26 = vmul.f32 %v2172_v60, %v2429_v40  ;;  %v1799_v40 = vld [vmem:[%s2554_s4] ss:$0 sm:$0xff] }
 0x4a7   : > { %v2174_v31 = vpop.eup %2173 }
 0x4a8   : > { %v2176_v39 = vpop.eup %2175  ;;  %v843_v34 = vmul.f32 %v2174_v31, %v2435_v43 }
 0x4a9   : > { %v844_v38 = vmul.f32 %v2176_v39, %v2433_v42 }
 0x4ab   : > { %v2178_v33 = vpop.eup %2177 }
 0x4ac   : > { %v2180_v36 = vpop.eup %2179  ;;  %v845_v41 = vmul.f32 %v2178_v33, %v2439_v45 }
 0x4ad   : > { %v846_v62 = vmul.f32 %v2180_v36, %v2437_v44 }
 0x4ca   : > { %v1983_v10 = vpop.f32.mrb[24].mxu1 }
 0x4cb   : > { %v1262_v12 = vpop.f32.mrb[25].mxu1  ;;  %v1310_v16 = vmul.f32 %v2152_v13, %v1983_v10 }
 0x4cc   : > { %v1309_v14 = vmul.f32 %v2150_v11, %v1262_v12 }
 0x4ce   : > { %v1986_v17 = vpop.f32.mrb[26].mxu1  ;;  %1997 = vmatprep.mubr.msk.f32.mxu0 %vm494_vm0, %v1309_v14 }
 0x4cf   : > { %v1272_v20 = vpop.f32.mrb[27].mxu1  ;;  %1998 = vmatmul.mubr.msk.f32.vlgmr.msra.gmra.mrb[16].mxu0 %vm494_vm0, %v1310_v16  ;;  %v1312_v24 = vmul.f32 %v2156_v21, %v1986_v17 }
 0x4d0   : > { %v1311_v23 = vmul.f32 %v2154_v19, %v1272_v20  ;;  %2068 = vmatpush3.bf16.msra.mxu0 %v2065_v18 }
 0x4d2   : > { %v1989_v25 = vpop.f32.mrb[28].mxu1  ;;  %2000 = vmatprep.mubr.msk.f32.mxu0 %vm494_vm0, %v1311_v23 }
 0x4d3   : > { %v1282_v29 = vpop.f32.mrb[29].mxu1  ;;  %2001 = vmatmul.mubr.msk.f32.gmra.mrb[18].mxu0 %vm494_vm0, %v1312_v24  ;;  %v1314_v46 = vmul.f32 %v2160_v30, %v1989_v25 }
 0x4d4   : > { %v1313_v32 = vmul.f32 %v2158_v27, %v1282_v29 }
 0x4d6   : > { %v1992_v49 = vpop.f32.mrb[30].mxu1  ;;  %2003 = vmatprep.mubr.msk.f32.mxu0 %vm494_vm0, %v1313_v32 }
 0x4d7   : > { %v1292_v51 = vpop.f32.mrb[31].mxu1  ;;  %2004 = vmatmul.mubr.msk.f32.gmra.mrb[20].mxu0 %vm494_vm0, %v1314_v46  ;;  %v1316_v55 = vmul.f32 %v2166_v52, %v1992_v49 }
 0x4d8   : > { %v1315_v53 = vmul.f32 %v2162_v47, %v1292_v51 }
 0x4da   : > { %2006 = vmatprep.mubr.msk.f32.mxu0 %vm494_vm0, %v1315_v53 }
 0x4db   : > { %2007 = vmatmul.mubr.msk.f32.gmra.mrb[22].mxu0 %vm494_vm0, %v1316_v55 }
 0x4dc   : > { %2013 = vmatprep.mubr.msk.f32.mxu0 %vm494_vm0, %v839_v57 }
 0x4df   : > { %2014 = vmatmul.mubr.msk.f32.vlgmr.msra.gmra.mrb[16].mxu0 %vm494_vm0, %v840_v59 }
 0x4e0   : > { %2016 = vmatprep.mubr.msk.f32.mxu0 %vm494_vm0, %v841_v61 }
 0x4e3   : > { %2017 = vmatmul.mubr.msk.f32.gmra.mrb[18].mxu0 %vm494_vm0, %v842_v26 }
 0x4e4   : > { %2019 = vmatprep.mubr.msk.f32.mxu0 %vm494_vm0, %v843_v34 }
 0x4e7   : > { %2020 = vmatmul.mubr.msk.f32.gmra.mrb[20].mxu0 %vm494_vm0, %v844_v38 }
 0x4e8   : > { %2022 = vmatprep.mubr.msk.f32.mxu0 %vm494_vm0, %v845_v41 }
 0x4eb   : > { %2023 = vmatmul.mubr.msk.f32.gmra.mrb[22].mxu0 %vm494_vm0, %v846_v62 }
 0x5b2   : > { %v2015_v42 = vpop.f32.mrb[16].mxu0 }
 0x5b3   : > { %v1586_v43 = vadd.f32 %v2015_v42, %v1799_v40  ;;  %v1539_v45 = vpop.f32.mrb[17].mxu0 }
 0x5b4   : > { %v1585_v35 = vadd.f32 %v1799_v40, %v1539_v45 }
 0x5b5   : > { %1594 = vst.msk [vmem:[%s345_s7 + $0x8] sm:$0xff] %vm359_vm1, %v1586_v43 }
 0x5b6   : > { %1593 = vst.msk [vmem:[%s345_s7] sm:$0xff] %vm359_vm1, %v1585_v35  ;;  %v2018_v44 = vpop.f32.mrb[18].mxu0 }
 0x5b7   : > { %v1588_v37 = vadd.f32 %v2018_v44, %v1799_v40  ;;  %v1549_v18 = vpop.f32.mrb[19].mxu0 }
 0x5b8   : > { %v1587_v63 = vadd.f32 %v1799_v40, %v1549_v18 }
 0x5b9   : > { %1596 = vst.msk [vmem:[%s345_s7 + $0x18] sm:$0xff] %vm359_vm1, %v1588_v37 }
 0x5ba   : > { %1595 = vst.msk [vmem:[%s345_s7 + $0x10] sm:$0xff] %vm359_vm1, %v1587_v63  ;;  %v2021_v0 = vpop.f32.mrb[20].mxu0 }
 0x5bb   : > { %v1590_v1 = vadd.f32 %v2021_v0, %v1799_v40  ;;  %v1559_v2 = vpop.f32.mrb[21].mxu0 }
 0x5bc   : > { %v1589_v3 = vadd.f32 %v1799_v40, %v1559_v2 }
 0x5bd   : > { %1598 = vst.msk [vmem:[%s345_s7 + $0x28] sm:$0xff] %vm359_vm1, %v1590_v1 }
 0x5be   : > { %1597 = vst.msk [vmem:[%s345_s7 + $0x20] sm:$0xff] %vm359_vm1, %v1589_v3  ;;  %v2024_v4 = vpop.f32.mrb[22].mxu0 }
 0x5bf   : > { %v1592_v5 = vadd.f32 %v2024_v4, %v1799_v40  ;;  %v1569_v6 = vpop.f32.mrb[23].mxu0 }
 0x5c0   : > { %v1591_v7 = vadd.f32 %v1799_v40, %v1569_v6 }
 0x5c1   : > { %1600 = vst.msk [vmem:[%s345_s7 + $0x38] sm:$0xff] %vm359_vm1, %v1592_v5 }
 0x5c2   : > { %1599 = vst.msk [vmem:[%s345_s7 + $0x30] sm:$0xff] %vm359_vm1, %v1591_v7 }
 0x5c3 PF: > { %s15_s22 = sadd.s32 1, %s2219_s22   ;;  %s2558_s18 = smov %s2207_s19 }
 0x5c4   : > { %p12_p10 = scmp.ge.s32.totalorder %s15_s22, 4   ;;  %s2559_s19 = smov %s2286_s26 }
 0x5c5   : > { %s2560_s20 = smov %s2215_s21  ;;  %s2561_s21 = smov %s2563_s23 }
 0x5c6   :  { %14 = sbr.rel (!%p12_p10) target bundleno = 3 (0x3), region = 121 }

</bundles_post_ra>
